<compile_context>
chip_gen: v7x
topology: tpu7x:2x2x1
jax: 0.10.0
libtpu: 0.0.40
codegen_flags: <defaults>
</compile_context>

<pallas_src>
import functools

import jax
import jax.numpy as jnp
import numpy as np
from jax.experimental import pallas as pl
from jax.experimental.pallas import tpu as pltpu

BN_EPS = 1e-5
LEAKY_SLOPE = 0.01  # F.leaky_relu default


def _leaky(x):
    return jnp.where(x >= 0, x, LEAKY_SLOPE * x)


# ----------------------------------------------------------------------------
# Single fused kernel: encoder lift + aux (Koopman) net + sequential rollout.
# ----------------------------------------------------------------------------
def _denis_fused_kernel(x_ref, x0_ref,
                        ew1_ref, eb1_ref, ew2_ref,
                        aw1_ref, ab1_ref, aw2t_ref,
                        p1_ref, p2_ref,
                        ytarg_ref, ypred_ref,
                        k_scr):
    M, _ = x_ref.shape                      # M = batch * n_shifts
    B = x0_ref.shape[0]
    S = M // B                              # n_shifts
    nsm1 = S - 1
    L = p1_ref.shape[1]                     # ldim = dim + enc_out

    # ---- state encoder: BatchNorm (batch stats over all M rows) + MLP ----
    x = x_ref[...]                          # (M, dim)
    mean = jnp.mean(x, axis=0, keepdims=True)
    var = jnp.mean((x - mean) ** 2, axis=0, keepdims=True)   # biased (BN train mode)
    rs = jax.lax.rsqrt(var + BN_EPS)

    ew1 = ew1_ref[...]
    eb1 = eb1_ref[...]
    ew2 = ew2_ref[...]                      # output_scale already folded in
    p1 = p1_ref[...]                        # (dim, L) = [I | 0]
    p2 = p2_ref[...]                        # (E,   L) = [0 | I]

    def lift(rows):
        """rows (R, dim) -> lifted state [rows | encoder(rows)] of shape (R, L)."""
        rn = (rows - mean) * rs
        h = _leaky(jnp.dot(rn, ew1, preferred_element_type=jnp.float32) + eb1)
        g = jnp.dot(h, ew2, preferred_element_type=jnp.float32)
        return (jnp.dot(rows, p1, preferred_element_type=jnp.float32)
                + jnp.dot(g, p2, preferred_element_type=jnp.float32))

    ys = lift(x)                            # (M, L)  lifted states for all time steps
    x0 = x0_ref[...]                        # (B, dim)
    y0 = lift(x0)                           # (B, L)  lifted initial states (same BN stats)

    # ---- aux net (Koopman operator), BatchNorm over the B initial states ----
    amean = jnp.mean(x0, axis=0, keepdims=True)
    avar = jnp.mean((x0 - amean) ** 2, axis=0, keepdims=True)
    x0n = (x0 - amean) * jax.lax.rsqrt(avar + BN_EPS)
    ha = _leaky(jnp.dot(x0n, aw1_ref[...], preferred_element_type=jnp.float32)
                + ab1_ref[...])             # (B, Ha)

    # Row i of K^T (all batches at once): ha @ aw2t[i]  -> (B, L)
    k_rows = [jnp.dot(ha, aw2t_ref[i], preferred_element_type=jnp.float32)
              for i in range(L)]

    for b in range(B):
        # y_targ for batch b: lifted states at times 1..S-1
        ytarg_ref[pl.ds(b * nsm1, nsm1), :] = ys[b * S + 1:(b + 1) * S, :]

        # assemble K^T (L x L) for batch b in VMEM scratch (avoids lane reshape)
        for i in range(L):
            k_scr[pl.ds(i, 1), :] = k_rows[i][b:b + 1, :]
        kb = k_scr[...]                     # (L, L)

        # Koopman rollout: y_{t+1} = y_t @ K^T
        y1 = y0[b:b + 1, :]                 # (1, L)
        for t in range(nsm1):
            y1 = jnp.dot(y1, kb, preferred_element_type=jnp.float32)
            ypred_ref[pl.ds(b * nsm1 + t, 1), :] = y1


# ----------------------------------------------------------------------------
# Wrapper
# ----------------------------------------------------------------------------
def denis_forward(weights, xs, n_shifts):
    B, T, dim = xs.shape
    assert n_shifts > 1 and T >= n_shifts
    Hx = weights["enc_w1"].shape[1]
    E = weights["enc_w2"].shape[1]
    Ha = weights["aux_w1"].shape[1]
    L = dim + E
    S = n_shifts
    nsm1 = S - 1
    M = B * S

    xs = xs.astype(jnp.float32)
    x_flat = xs[:, :S, :].reshape(M, dim)
    x0 = xs[:, 0, :]

    # Fold output_scale into the bias-free last linear layers (exact up to rounding).
    enc_w2_eff = weights["enc_w2"] * weights["enc_scale"][None, :]
    aux_w2_eff = weights["aux_w2"] * weights["aux_scale"][None, :]
    # (Ha, L*L) -> (L, Ha, L): aw2t[i] maps hidden -> row i of K^T (torch .view order).
    aw2t = aux_w2_eff.reshape(Ha, L, L).transpose(1, 0, 2)
    eb1 = weights["enc_b1"].reshape(1, Hx)
    ab1 = weights["aux_b1"].reshape(1, Ha)
    # Placement matrices: [x | g] = x @ [I|0] + g @ [0|I]  (no in-kernel concat).
    p1 = jnp.concatenate([jnp.eye(dim, dtype=jnp.float32),
                          jnp.zeros((dim, E), jnp.float32)], axis=1)
    p2 = jnp.concatenate([jnp.zeros((E, dim), jnp.float32),
                          jnp.eye(E, dtype=jnp.float32)], axis=1)

    y_targ, y_pred = pl.pallas_call(
        _denis_fused_kernel,
        out_shape=(jax.ShapeDtypeStruct((B * nsm1, L), jnp.float32),
                   jax.ShapeDtypeStruct((B * nsm1, L), jnp.float32)),
        grid=(1,),
        in_specs=[
            pl.BlockSpec((M, dim), lambda i: (0, 0)),
            pl.BlockSpec((B, dim), lambda i: (0, 0)),
            pl.BlockSpec((dim, Hx), lambda i: (0, 0)),
            pl.BlockSpec((1, Hx), lambda i: (0, 0)),
            pl.BlockSpec((Hx, E), lambda i: (0, 0)),
            pl.BlockSpec((dim, Ha), lambda i: (0, 0)),
            pl.BlockSpec((1, Ha), lambda i: (0, 0)),
            pl.BlockSpec((L, Ha, L), lambda i: (0, 0, 0)),
            pl.BlockSpec((dim, L), lambda i: (0, 0)),
            pl.BlockSpec((E, L), lambda i: (0, 0)),
        ],
        out_specs=(pl.BlockSpec((B * nsm1, L), lambda i: (0, 0)),
                   pl.BlockSpec((B * nsm1, L), lambda i: (0, 0))),
        scratch_shapes=[pltpu.VMEM((L, L), jnp.float32)],
        compiler_params=pltpu.CompilerParams(dimension_semantics=("arbitrary",)),
    )(x_flat, x0, weights["enc_w1"], eb1, enc_w2_eff,
      weights["aux_w1"], ab1, aw2t, p1, p2)

    return (y_targ.reshape(B, nsm1, L), y_pred.reshape(B, nsm1, L))


# ----------------------------------------------------------------------------
# Pure-JAX reference mirroring the PyTorch forward exactly (for verification)
# ----------------------------------------------------------------------------
def _enc_ref(rows, w1, b1, w2, scale):
    mean = jnp.mean(rows, axis=0, keepdims=True)
    var = jnp.mean((rows - mean) ** 2, axis=0, keepdims=True)
    xn = (rows - mean) / jnp.sqrt(var + BN_EPS)
    h = _leaky(xn @ w1 + b1)
    return (h @ w2) * scale


def reference_forward(weights, xs, n_shifts):
    B, _, dim = xs.shape
    E = weights["enc_w2"].shape[1]
    L = dim + E
    S = n_shifts

    x0 = xs[:, 0, :]
    kflat = _enc_ref(x0, weights["aux_w1"], weights["aux_b1"],
                     weights["aux_w2"], weights["aux_scale"])
    koop = kflat.reshape(B, L, L)                        # K^T per batch element

    x_enc = xs[:, :S, :]
    g = _enc_ref(x_enc.reshape(B * S, dim), weights["enc_w1"], weights["enc_b1"],
                 weights["enc_w2"], weights["enc_scale"]).reshape(B, S, E)
    ys = jnp.concatenate([x_enc, g], axis=-1)            # (B, S, L)
    y_targ = ys[:, 1:, :]

    y1 = ys[:, 0:1, :]
    preds = []
    for _ in range(S - 1):
        y1 = jnp.einsum('bil,blj->bij', y1, koop)
        preds.append(y1)
    y_pred = jnp.concatenate(preds, axis=1)
    return y_targ, y_pred


# ----------------------------------------------------------------------------
# Deterministic synthetic parameters (mirrors module __init__ shapes)
# ----------------------------------------------------------------------------
def init_weights(key, dim, hidden_x, e_out, hidden_a):
    L = dim + e_out
    ks = jax.random.split(key, 6)

    def uni(k, shape, s=0.3):
        return jax.random.uniform(k, shape, jnp.float32, -s, s)

    return dict(
        enc_w1=uni(ks[0], (dim, hidden_x)),
        enc_b1=uni(ks[1], (hidden_x,)),
        enc_w2=uni(ks[2], (hidden_x, e_out)),
        enc_scale=jnp.ones((e_out,), jnp.float32),
        aux_w1=uni(ks[3], (dim, hidden_a)),
        aux_b1=uni(ks[4], (hidden_a,)),
        aux_w2=uni(ks[5], (hidden_a, L * L), s=0.15),
        aux_scale=jnp.ones((L * L,), jnp.float32),
    )


if __name__ == "__main__":
    # enc_x_shape = [4, 16, 8], aux_shape = [4, 16, 12] (-> [4, 16, 144]), n_shifts = 5
    dim, hidden_x, e_out, hidden_a = 4, 16, 8, 16
    n_shifts, batch, T = 5, 2, 6
    ldim = dim + e_out

    key = jax.random.PRNGKey(0)
    kw, kx = jax.random.split(key)
    weights = init_weights(kw, dim, hidden_x, e_out, hidden_a)
    xs = jax.random.normal(kx, (batch, T, dim), jnp.float32)

    fwd = jax.jit(functools.partial(denis_forward, n_shifts=n_shifts))
    y_targ, y_pred = fwd(weights, xs)
    y_targ = jax.block_until_ready(y_targ)
    y_pred = jax.block_until_ready(y_pred)

    y_targ_ref, y_pred_ref = reference_forward(weights, xs, n_shifts)
    np.testing.assert_allclose(np.asarray(y_targ), np.asarray(y_targ_ref),
                               rtol=1e-3, atol=1e-3)
    np.testing.assert_allclose(np.asarray(y_pred), np.asarray(y_pred_ref),
                               rtol=1e-3, atol=1e-3)

    assert y_targ.shape == (batch, n_shifts - 1, ldim)
    assert y_pred.shape == (batch, n_shifts - 1, ldim)
    print("KERNEL_OK")
</pallas_src>

<mosaic_0001>
module attributes {stable_mosaic.version = 11 : i64} {
  func.func @_denis_fused_kernel(%arg0: i32, %arg1: memref<10x4xf32, #tpu.memory_space<vmem>>, %arg2: memref<2x4xf32, #tpu.memory_space<vmem>>, %arg3: memref<4x16xf32, #tpu.memory_space<vmem>>, %arg4: memref<1x16xf32, #tpu.memory_space<vmem>>, %arg5: memref<16x8xf32, #tpu.memory_space<vmem>>, %arg6: memref<4x16xf32, #tpu.memory_space<vmem>>, %arg7: memref<1x16xf32, #tpu.memory_space<vmem>>, %arg8: memref<12x16x12xf32, #tpu.memory_space<vmem>>, %arg9: memref<4x12xf32, #tpu.memory_space<vmem>>, %arg10: memref<8x12xf32, #tpu.memory_space<vmem>>, %arg11: memref<8x12xf32, #tpu.memory_space<vmem>>, %arg12: memref<8x12xf32, #tpu.memory_space<vmem>>, %arg13: memref<12x12xf32, #tpu.memory_space<vmem>>) attributes {dimension_semantics = [#tpu.dimension_semantics<arbitrary>], iteration_bounds = array<i64: 1>, scalar_prefetch = 0 : i64, scratch_operands = 1 : i64, tpu.core_type = #tpu.core_type<tc>, window_params = [{pipeline_mode = #tpu.pipeline_mode<synchronous>, transform_indices = @transform_0, window_bounds = array<i64: 10, 4>}, {pipeline_mode = #tpu.pipeline_mode<synchronous>, transform_indices = @transform_1, window_bounds = array<i64: 2, 4>}, {pipeline_mode = #tpu.pipeline_mode<synchronous>, transform_indices = @transform_2, window_bounds = array<i64: 4, 16>}, {pipeline_mode = #tpu.pipeline_mode<synchronous>, transform_indices = @transform_3, window_bounds = array<i64: 1, 16>}, {pipeline_mode = #tpu.pipeline_mode<synchronous>, transform_indices = @transform_4, window_bounds = array<i64: 16, 8>}, {pipeline_mode = #tpu.pipeline_mode<synchronous>, transform_indices = @transform_5, window_bounds = array<i64: 4, 16>}, {pipeline_mode = #tpu.pipeline_mode<synchronous>, transform_indices = @transform_6, window_bounds = array<i64: 1, 16>}, {pipeline_mode = #tpu.pipeline_mode<synchronous>, transform_indices = @transform_7, window_bounds = array<i64: 12, 16, 12>}, {pipeline_mode = #tpu.pipeline_mode<synchronous>, transform_indices = @transform_8, window_bounds = array<i64: 4, 12>}, {pipeline_mode = #tpu.pipeline_mode<synchronous>, transform_indices = @transform_9, window_bounds = array<i64: 8, 12>}, {pipeline_mode = #tpu.pipeline_mode<synchronous>, transform_indices = @transform_10, window_bounds = array<i64: 8, 12>}, {pipeline_mode = #tpu.pipeline_mode<synchronous>, transform_indices = @transform_11, window_bounds = array<i64: 8, 12>}]} {
    %c0 = arith.constant 0 : index
    %c0_0 = arith.constant 0 : index
    %0 = vector.load %arg1[%c0, %c0_0] : memref<10x4xf32, #tpu.memory_space<vmem>>, vector<10x4xf32>
    %cst = arith.constant dense<0.000000e+00> : vector<4xf32>
    %1 = vector.multi_reduction <add>, %0, %cst [0] : vector<10x4xf32> to vector<4xf32>
    %2 = vector.shape_cast %1 : vector<4xf32> to vector<1x4xf32>
    %cst_1 = arith.constant 1.000000e+01 : f32
    %3 = vector.broadcast %cst_1 : f32 to vector<1x4xf32>
    %4 = arith.divf %2, %3 : vector<1x4xf32>
    %5 = vector.broadcast %4 : vector<1x4xf32> to vector<10x4xf32>
    %6 = arith.subf %0, %5 : vector<10x4xf32>
    %7 = arith.mulf %6, %6 : vector<10x4xf32>
    %cst_2 = arith.constant dense<0.000000e+00> : vector<4xf32>
    %8 = vector.multi_reduction <add>, %7, %cst_2 [0] : vector<10x4xf32> to vector<4xf32>
    %9 = vector.shape_cast %8 : vector<4xf32> to vector<1x4xf32>
    %cst_3 = arith.constant 1.000000e+01 : f32
    %10 = vector.broadcast %cst_3 : f32 to vector<1x4xf32>
    %11 = arith.divf %9, %10 : vector<1x4xf32>
    %cst_4 = arith.constant 9.99999974E-6 : f32
    %12 = vector.broadcast %cst_4 : f32 to vector<1x4xf32>
    %13 = arith.addf %11, %12 : vector<1x4xf32>
    %14 = math.rsqrt %13 : vector<1x4xf32>
    %c0_5 = arith.constant 0 : index
    %c0_6 = arith.constant 0 : index
    %15 = vector.load %arg3[%c0_5, %c0_6] : memref<4x16xf32, #tpu.memory_space<vmem>>, vector<4x16xf32>
    %c0_7 = arith.constant 0 : index
    %c0_8 = arith.constant 0 : index
    %16 = vector.load %arg4[%c0_7, %c0_8] : memref<1x16xf32, #tpu.memory_space<vmem>>, vector<1x16xf32>
    %c0_9 = arith.constant 0 : index
    %c0_10 = arith.constant 0 : index
    %17 = vector.load %arg5[%c0_9, %c0_10] : memref<16x8xf32, #tpu.memory_space<vmem>>, vector<16x8xf32>
    %c0_11 = arith.constant 0 : index
    %c0_12 = arith.constant 0 : index
    %18 = vector.load %arg9[%c0_11, %c0_12] : memref<4x12xf32, #tpu.memory_space<vmem>>, vector<4x12xf32>
    %c0_13 = arith.constant 0 : index
    %c0_14 = arith.constant 0 : index
    %19 = vector.load %arg10[%c0_13, %c0_14] : memref<8x12xf32, #tpu.memory_space<vmem>>, vector<8x12xf32>
    %20 = vector.broadcast %4 : vector<1x4xf32> to vector<10x4xf32>
    %21 = arith.subf %0, %20 : vector<10x4xf32>
    %22 = vector.broadcast %14 : vector<1x4xf32> to vector<10x4xf32>
    %23 = arith.mulf %21, %22 : vector<10x4xf32>
    %cst_15 = arith.constant dense<0.000000e+00> : vector<10x16xf32>
    %24 = tpu.matmul %23, %15, %cst_15 {dimension_numbers = #tpu.dot_dimension_numbers<[1], [0], [0], [1], [0, 0, 1, 1], [], []>} : vector<10x4xf32>, vector<4x16xf32>, vector<10x16xf32> -> vector<10x16xf32>
    %25 = vector.broadcast %16 : vector<1x16xf32> to vector<10x16xf32>
    %26 = arith.addf %24, %25 : vector<10x16xf32>
    %cst_16 = arith.constant 0.000000e+00 : f32
    %27 = vector.broadcast %cst_16 : f32 to vector<10x16xf32>
    %28 = arith.cmpf oge, %26, %27 : vector<10x16xf32>
    %cst_17 = arith.constant 0.00999999977 : f32
    %29 = vector.broadcast %cst_17 : f32 to vector<10x16xf32>
    %30 = arith.mulf %29, %26 : vector<10x16xf32>
    %31 = arith.select %28, %26, %30 : vector<10x16xi1>, vector<10x16xf32>
    %cst_18 = arith.constant dense<0.000000e+00> : vector<10x8xf32>
    %32 = tpu.matmul %31, %17, %cst_18 {dimension_numbers = #tpu.dot_dimension_numbers<[1], [0], [0], [1], [0, 0, 1, 1], [], []>} : vector<10x16xf32>, vector<16x8xf32>, vector<10x8xf32> -> vector<10x8xf32>
    %cst_19 = arith.constant dense<0.000000e+00> : vector<10x12xf32>
    %33 = tpu.matmul %0, %18, %cst_19 {dimension_numbers = #tpu.dot_dimension_numbers<[1], [0], [0], [1], [0, 0, 1, 1], [], []>} : vector<10x4xf32>, vector<4x12xf32>, vector<10x12xf32> -> vector<10x12xf32>
    %cst_20 = arith.constant dense<0.000000e+00> : vector<10x12xf32>
    %34 = tpu.matmul %32, %19, %cst_20 {dimension_numbers = #tpu.dot_dimension_numbers<[1], [0], [0], [1], [0, 0, 1, 1], [], []>} : vector<10x8xf32>, vector<8x12xf32>, vector<10x12xf32> -> vector<10x12xf32>
    %35 = arith.addf %33, %34 : vector<10x12xf32>
    %c0_21 = arith.constant 0 : index
    %c0_22 = arith.constant 0 : index
    %36 = vector.load %arg2[%c0_21, %c0_22] : memref<2x4xf32, #tpu.memory_space<vmem>>, vector<2x4xf32>
    %37 = vector.broadcast %4 : vector<1x4xf32> to vector<2x4xf32>
    %38 = arith.subf %36, %37 : vector<2x4xf32>
    %39 = vector.broadcast %14 : vector<1x4xf32> to vector<2x4xf32>
    %40 = arith.mulf %38, %39 : vector<2x4xf32>
    %cst_23 = arith.constant dense<0.000000e+00> : vector<2x16xf32>
    %41 = tpu.matmul %40, %15, %cst_23 {dimension_numbers = #tpu.dot_dimension_numbers<[1], [0], [0], [1], [0, 0, 1, 1], [], []>} : vector<2x4xf32>, vector<4x16xf32>, vector<2x16xf32> -> vector<2x16xf32>
    %42 = vector.broadcast %16 : vector<1x16xf32> to vector<2x16xf32>
    %43 = arith.addf %41, %42 : vector<2x16xf32>
    %cst_24 = arith.constant 0.000000e+00 : f32
    %44 = vector.broadcast %cst_24 : f32 to vector<2x16xf32>
    %45 = arith.cmpf oge, %43, %44 : vector<2x16xf32>
    %cst_25 = arith.constant 0.00999999977 : f32
    %46 = vector.broadcast %cst_25 : f32 to vector<2x16xf32>
    %47 = arith.mulf %46, %43 : vector<2x16xf32>
    %48 = arith.select %45, %43, %47 : vector<2x16xi1>, vector<2x16xf32>
    %cst_26 = arith.constant dense<0.000000e+00> : vector<2x8xf32>
    %49 = tpu.matmul %48, %17, %cst_26 {dimension_numbers = #tpu.dot_dimension_numbers<[1], [0], [0], [1], [0, 0, 1, 1], [], []>} : vector<2x16xf32>, vector<16x8xf32>, vector<2x8xf32> -> vector<2x8xf32>
    %cst_27 = arith.constant dense<0.000000e+00> : vector<2x12xf32>
    %50 = tpu.matmul %36, %18, %cst_27 {dimension_numbers = #tpu.dot_dimension_numbers<[1], [0], [0], [1], [0, 0, 1, 1], [], []>} : vector<2x4xf32>, vector<4x12xf32>, vector<2x12xf32> -> vector<2x12xf32>
    %cst_28 = arith.constant dense<0.000000e+00> : vector<2x12xf32>
    %51 = tpu.matmul %49, %19, %cst_28 {dimension_numbers = #tpu.dot_dimension_numbers<[1], [0], [0], [1], [0, 0, 1, 1], [], []>} : vector<2x8xf32>, vector<8x12xf32>, vector<2x12xf32> -> vector<2x12xf32>
    %52 = arith.addf %50, %51 : vector<2x12xf32>
    %cst_29 = arith.constant dense<0.000000e+00> : vector<4xf32>
    %53 = vector.multi_reduction <add>, %36, %cst_29 [0] : vector<2x4xf32> to vector<4xf32>
    %54 = vector.shape_cast %53 : vector<4xf32> to vector<1x4xf32>
    %cst_30 = arith.constant 2.000000e+00 : f32
    %55 = vector.broadcast %cst_30 : f32 to vector<1x4xf32>
    %56 = arith.divf %54, %55 : vector<1x4xf32>
    %57 = vector.broadcast %56 : vector<1x4xf32> to vector<2x4xf32>
    %58 = arith.subf %36, %57 : vector<2x4xf32>
    %59 = arith.mulf %58, %58 : vector<2x4xf32>
    %cst_31 = arith.constant dense<0.000000e+00> : vector<4xf32>
    %60 = vector.multi_reduction <add>, %59, %cst_31 [0] : vector<2x4xf32> to vector<4xf32>
    %61 = vector.shape_cast %60 : vector<4xf32> to vector<1x4xf32>
    %cst_32 = arith.constant 2.000000e+00 : f32
    %62 = vector.broadcast %cst_32 : f32 to vector<1x4xf32>
    %63 = arith.divf %61, %62 : vector<1x4xf32>
    %64 = vector.broadcast %56 : vector<1x4xf32> to vector<2x4xf32>
    %65 = arith.subf %36, %64 : vector<2x4xf32>
    %cst_33 = arith.constant 9.99999974E-6 : f32
    %66 = vector.broadcast %cst_33 : f32 to vector<1x4xf32>
    %67 = arith.addf %63, %66 : vector<1x4xf32>
    %68 = math.rsqrt %67 : vector<1x4xf32>
    %69 = vector.broadcast %68 : vector<1x4xf32> to vector<2x4xf32>
    %70 = arith.mulf %65, %69 : vector<2x4xf32>
    %c0_34 = arith.constant 0 : index
    %c0_35 = arith.constant 0 : index
    %71 = vector.load %arg6[%c0_34, %c0_35] : memref<4x16xf32, #tpu.memory_space<vmem>>, vector<4x16xf32>
    %cst_36 = arith.constant dense<0.000000e+00> : vector<2x16xf32>
    %72 = tpu.matmul %70, %71, %cst_36 {dimension_numbers = #tpu.dot_dimension_numbers<[1], [0], [0], [1], [0, 0, 1, 1], [], []>} : vector<2x4xf32>, vector<4x16xf32>, vector<2x16xf32> -> vector<2x16xf32>
    %c0_37 = arith.constant 0 : index
    %c0_38 = arith.constant 0 : index
    %73 = vector.load %arg7[%c0_37, %c0_38] : memref<1x16xf32, #tpu.memory_space<vmem>>, vector<1x16xf32>
    %74 = vector.broadcast %73 : vector<1x16xf32> to vector<2x16xf32>
    %75 = arith.addf %72, %74 : vector<2x16xf32>
    %cst_39 = arith.constant 0.000000e+00 : f32
    %76 = vector.broadcast %cst_39 : f32 to vector<2x16xf32>
    %77 = arith.cmpf oge, %75, %76 : vector<2x16xf32>
    %cst_40 = arith.constant 0.00999999977 : f32
    %78 = vector.broadcast %cst_40 : f32 to vector<2x16xf32>
    %79 = arith.mulf %78, %75 : vector<2x16xf32>
    %80 = arith.select %77, %75, %79 : vector<2x16xi1>, vector<2x16xf32>
    %c0_41 = arith.constant 0 : index
    %c0_42 = arith.constant 0 : index
    %c0_43 = arith.constant 0 : index
    %81 = vector.load %arg8[%c0_41, %c0_42, %c0_43] : memref<12x16x12xf32, #tpu.memory_space<vmem>>, vector<1x16x12xf32>
    %82 = vector.shape_cast %81 : vector<1x16x12xf32> to vector<16x12xf32>
    %cst_44 = arith.constant dense<0.000000e+00> : vector<2x12xf32>
    %83 = tpu.matmul %80, %82, %cst_44 {dimension_numbers = #tpu.dot_dimension_numbers<[1], [0], [0], [1], [0, 0, 1, 1], [], []>} : vector<2x16xf32>, vector<16x12xf32>, vector<2x12xf32> -> vector<2x12xf32>
    %c1 = arith.constant 1 : index
    %c0_45 = arith.constant 0 : index
    %c0_46 = arith.constant 0 : index
    %84 = vector.load %arg8[%c1, %c0_45, %c0_46] : memref<12x16x12xf32, #tpu.memory_space<vmem>>, vector<1x16x12xf32>
    %85 = vector.shape_cast %84 : vector<1x16x12xf32> to vector<16x12xf32>
    %cst_47 = arith.constant dense<0.000000e+00> : vector<2x12xf32>
    %86 = tpu.matmul %80, %85, %cst_47 {dimension_numbers = #tpu.dot_dimension_numbers<[1], [0], [0], [1], [0, 0, 1, 1], [], []>} : vector<2x16xf32>, vector<16x12xf32>, vector<2x12xf32> -> vector<2x12xf32>
    %c2 = arith.constant 2 : index
    %c0_48 = arith.constant 0 : index
    %c0_49 = arith.constant 0 : index
    %87 = vector.load %arg8[%c2, %c0_48, %c0_49] : memref<12x16x12xf32, #tpu.memory_space<vmem>>, vector<1x16x12xf32>
    %88 = vector.shape_cast %87 : vector<1x16x12xf32> to vector<16x12xf32>
    %cst_50 = arith.constant dense<0.000000e+00> : vector<2x12xf32>
    %89 = tpu.matmul %80, %88, %cst_50 {dimension_numbers = #tpu.dot_dimension_numbers<[1], [0], [0], [1], [0, 0, 1, 1], [], []>} : vector<2x16xf32>, vector<16x12xf32>, vector<2x12xf32> -> vector<2x12xf32>
    %c3 = arith.constant 3 : index
    %c0_51 = arith.constant 0 : index
    %c0_52 = arith.constant 0 : index
    %90 = vector.load %arg8[%c3, %c0_51, %c0_52] : memref<12x16x12xf32, #tpu.memory_space<vmem>>, vector<1x16x12xf32>
    %91 = vector.shape_cast %90 : vector<1x16x12xf32> to vector<16x12xf32>
    %cst_53 = arith.constant dense<0.000000e+00> : vector<2x12xf32>
    %92 = tpu.matmul %80, %91, %cst_53 {dimension_numbers = #tpu.dot_dimension_numbers<[1], [0], [0], [1], [0, 0, 1, 1], [], []>} : vector<2x16xf32>, vector<16x12xf32>, vector<2x12xf32> -> vector<2x12xf32>
    %c4 = arith.constant 4 : index
    %c0_54 = arith.constant 0 : index
    %c0_55 = arith.constant 0 : index
    %93 = vector.load %arg8[%c4, %c0_54, %c0_55] : memref<12x16x12xf32, #tpu.memory_space<vmem>>, vector<1x16x12xf32>
    %94 = vector.shape_cast %93 : vector<1x16x12xf32> to vector<16x12xf32>
    %cst_56 = arith.constant dense<0.000000e+00> : vector<2x12xf32>
    %95 = tpu.matmul %80, %94, %cst_56 {dimension_numbers = #tpu.dot_dimension_numbers<[1], [0], [0], [1], [0, 0, 1, 1], [], []>} : vector<2x16xf32>, vector<16x12xf32>, vector<2x12xf32> -> vector<2x12xf32>
    %c5 = arith.constant 5 : index
    %c0_57 = arith.constant 0 : index
    %c0_58 = arith.constant 0 : index
    %96 = vector.load %arg8[%c5, %c0_57, %c0_58] : memref<12x16x12xf32, #tpu.memory_space<vmem>>, vector<1x16x12xf32>
    %97 = vector.shape_cast %96 : vector<1x16x12xf32> to vector<16x12xf32>
    %cst_59 = arith.constant dense<0.000000e+00> : vector<2x12xf32>
    %98 = tpu.matmul %80, %97, %cst_59 {dimension_numbers = #tpu.dot_dimension_numbers<[1], [0], [0], [1], [0, 0, 1, 1], [], []>} : vector<2x16xf32>, vector<16x12xf32>, vector<2x12xf32> -> vector<2x12xf32>
    %c6 = arith.constant 6 : index
    %c0_60 = arith.constant 0 : index
    %c0_61 = arith.constant 0 : index
    %99 = vector.load %arg8[%c6, %c0_60, %c0_61] : memref<12x16x12xf32, #tpu.memory_space<vmem>>, vector<1x16x12xf32>
    %100 = vector.shape_cast %99 : vector<1x16x12xf32> to vector<16x12xf32>
    %cst_62 = arith.constant dense<0.000000e+00> : vector<2x12xf32>
    %101 = tpu.matmul %80, %100, %cst_62 {dimension_numbers = #tpu.dot_dimension_numbers<[1], [0], [0], [1], [0, 0, 1, 1], [], []>} : vector<2x16xf32>, vector<16x12xf32>, vector<2x12xf32> -> vector<2x12xf32>
    %c7 = arith.constant 7 : index
    %c0_63 = arith.constant 0 : index
    %c0_64 = arith.constant 0 : index
    %102 = vector.load %arg8[%c7, %c0_63, %c0_64] : memref<12x16x12xf32, #tpu.memory_space<vmem>>, vector<1x16x12xf32>
    %103 = vector.shape_cast %102 : vector<1x16x12xf32> to vector<16x12xf32>
    %cst_65 = arith.constant dense<0.000000e+00> : vector<2x12xf32>
    %104 = tpu.matmul %80, %103, %cst_65 {dimension_numbers = #tpu.dot_dimension_numbers<[1], [0], [0], [1], [0, 0, 1, 1], [], []>} : vector<2x16xf32>, vector<16x12xf32>, vector<2x12xf32> -> vector<2x12xf32>
    %c8 = arith.constant 8 : index
    %c0_66 = arith.constant 0 : index
    %c0_67 = arith.constant 0 : index
    %105 = vector.load %arg8[%c8, %c0_66, %c0_67] : memref<12x16x12xf32, #tpu.memory_space<vmem>>, vector<1x16x12xf32>
    %106 = vector.shape_cast %105 : vector<1x16x12xf32> to vector<16x12xf32>
    %cst_68 = arith.constant dense<0.000000e+00> : vector<2x12xf32>
    %107 = tpu.matmul %80, %106, %cst_68 {dimension_numbers = #tpu.dot_dimension_numbers<[1], [0], [0], [1], [0, 0, 1, 1], [], []>} : vector<2x16xf32>, vector<16x12xf32>, vector<2x12xf32> -> vector<2x12xf32>
    %c9 = arith.constant 9 : index
    %c0_69 = arith.constant 0 : index
    %c0_70 = arith.constant 0 : index
    %108 = vector.load %arg8[%c9, %c0_69, %c0_70] : memref<12x16x12xf32, #tpu.memory_space<vmem>>, vector<1x16x12xf32>
    %109 = vector.shape_cast %108 : vector<1x16x12xf32> to vector<16x12xf32>
    %cst_71 = arith.constant dense<0.000000e+00> : vector<2x12xf32>
    %110 = tpu.matmul %80, %109, %cst_71 {dimension_numbers = #tpu.dot_dimension_numbers<[1], [0], [0], [1], [0, 0, 1, 1], [], []>} : vector<2x16xf32>, vector<16x12xf32>, vector<2x12xf32> -> vector<2x12xf32>
    %c10 = arith.constant 10 : index
    %c0_72 = arith.constant 0 : index
    %c0_73 = arith.constant 0 : index
    %111 = vector.load %arg8[%c10, %c0_72, %c0_73] : memref<12x16x12xf32, #tpu.memory_space<vmem>>, vector<1x16x12xf32>
    %112 = vector.shape_cast %111 : vector<1x16x12xf32> to vector<16x12xf32>
    %cst_74 = arith.constant dense<0.000000e+00> : vector<2x12xf32>
    %113 = tpu.matmul %80, %112, %cst_74 {dimension_numbers = #tpu.dot_dimension_numbers<[1], [0], [0], [1], [0, 0, 1, 1], [], []>} : vector<2x16xf32>, vector<16x12xf32>, vector<2x12xf32> -> vector<2x12xf32>
    %c11 = arith.constant 11 : index
    %c0_75 = arith.constant 0 : index
    %c0_76 = arith.constant 0 : index
    %114 = vector.load %arg8[%c11, %c0_75, %c0_76] : memref<12x16x12xf32, #tpu.memory_space<vmem>>, vector<1x16x12xf32>
    %115 = vector.shape_cast %114 : vector<1x16x12xf32> to vector<16x12xf32>
    %cst_77 = arith.constant dense<0.000000e+00> : vector<2x12xf32>
    %116 = tpu.matmul %80, %115, %cst_77 {dimension_numbers = #tpu.dot_dimension_numbers<[1], [0], [0], [1], [0, 0, 1, 1], [], []>} : vector<2x16xf32>, vector<16x12xf32>, vector<2x12xf32> -> vector<2x12xf32>
    %117 = vector.extract_strided_slice %35 {offsets = [1, 0], sizes = [4, 12], strides = [1, 1]} : vector<10x12xf32> to vector<4x12xf32>
    %c0_78 = arith.constant 0 : index
    %c0_79 = arith.constant 0 : index
    %118 = vector.load %arg11[%c0_78, %c0_79] : memref<8x12xf32, #tpu.memory_space<vmem>>, vector<4x12xf32>
    tpu.vector_store %arg11[%c0_78, %c0_79], %117 {strides = array<i32>} : memref<8x12xf32, #tpu.memory_space<vmem>>, vector<4x12xf32>,
    %119 = vector.extract_strided_slice %83 {offsets = [0, 0], sizes = [1, 12], strides = [1, 1]} : vector<2x12xf32> to vector<1x12xf32>
    %c0_80 = arith.constant 0 : index
    %c0_81 = arith.constant 0 : index
    %120 = vector.load %arg13[%c0_80, %c0_81] : memref<12x12xf32, #tpu.memory_space<vmem>>, vector<1x12xf32>
    tpu.vector_store %arg13[%c0_80, %c0_81], %119 {strides = array<i32>} : memref<12x12xf32, #tpu.memory_space<vmem>>, vector<1x12xf32>,
    %121 = vector.extract_strided_slice %86 {offsets = [0, 0], sizes = [1, 12], strides = [1, 1]} : vector<2x12xf32> to vector<1x12xf32>
    %c1_82 = arith.constant 1 : index
    %c0_83 = arith.constant 0 : index
    %122 = vector.load %arg13[%c1_82, %c0_83] : memref<12x12xf32, #tpu.memory_space<vmem>>, vector<1x12xf32>
    tpu.vector_store %arg13[%c1_82, %c0_83], %121 {strides = array<i32>} : memref<12x12xf32, #tpu.memory_space<vmem>>, vector<1x12xf32>,
    %123 = vector.extract_strided_slice %89 {offsets = [0, 0], sizes = [1, 12], strides = [1, 1]} : vector<2x12xf32> to vector<1x12xf32>
    %c2_84 = arith.constant 2 : index
    %c0_85 = arith.constant 0 : index
    %124 = vector.load %arg13[%c2_84, %c0_85] : memref<12x12xf32, #tpu.memory_space<vmem>>, vector<1x12xf32>
    tpu.vector_store %arg13[%c2_84, %c0_85], %123 {strides = array<i32>} : memref<12x12xf32, #tpu.memory_space<vmem>>, vector<1x12xf32>,
    %125 = vector.extract_strided_slice %92 {offsets = [0, 0], sizes = [1, 12], strides = [1, 1]} : vector<2x12xf32> to vector<1x12xf32>
    %c3_86 = arith.constant 3 : index
    %c0_87 = arith.constant 0 : index
    %126 = vector.load %arg13[%c3_86, %c0_87] : memref<12x12xf32, #tpu.memory_space<vmem>>, vector<1x12xf32>
    tpu.vector_store %arg13[%c3_86, %c0_87], %125 {strides = array<i32>} : memref<12x12xf32, #tpu.memory_space<vmem>>, vector<1x12xf32>,
    %127 = vector.extract_strided_slice %95 {offsets = [0, 0], sizes = [1, 12], strides = [1, 1]} : vector<2x12xf32> to vector<1x12xf32>
    %c4_88 = arith.constant 4 : index
    %c0_89 = arith.constant 0 : index
    %128 = vector.load %arg13[%c4_88, %c0_89] : memref<12x12xf32, #tpu.memory_space<vmem>>, vector<1x12xf32>
    tpu.vector_store %arg13[%c4_88, %c0_89], %127 {strides = array<i32>} : memref<12x12xf32, #tpu.memory_space<vmem>>, vector<1x12xf32>,
    %129 = vector.extract_strided_slice %98 {offsets = [0, 0], sizes = [1, 12], strides = [1, 1]} : vector<2x12xf32> to vector<1x12xf32>
    %c5_90 = arith.constant 5 : index
    %c0_91 = arith.constant 0 : index
    %130 = vector.load %arg13[%c5_90, %c0_91] : memref<12x12xf32, #tpu.memory_space<vmem>>, vector<1x12xf32>
    tpu.vector_store %arg13[%c5_90, %c0_91], %129 {strides = array<i32>} : memref<12x12xf32, #tpu.memory_space<vmem>>, vector<1x12xf32>,
    %131 = vector.extract_strided_slice %101 {offsets = [0, 0], sizes = [1, 12], strides = [1, 1]} : vector<2x12xf32> to vector<1x12xf32>
    %c6_92 = arith.constant 6 : index
    %c0_93 = arith.constant 0 : index
    %132 = vector.load %arg13[%c6_92, %c0_93] : memref<12x12xf32, #tpu.memory_space<vmem>>, vector<1x12xf32>
    tpu.vector_store %arg13[%c6_92, %c0_93], %131 {strides = array<i32>} : memref<12x12xf32, #tpu.memory_space<vmem>>, vector<1x12xf32>,
    %133 = vector.extract_strided_slice %104 {offsets = [0, 0], sizes = [1, 12], strides = [1, 1]} : vector<2x12xf32> to vector<1x12xf32>
    %c7_94 = arith.constant 7 : index
    %c0_95 = arith.constant 0 : index
    %134 = vector.load %arg13[%c7_94, %c0_95] : memref<12x12xf32, #tpu.memory_space<vmem>>, vector<1x12xf32>
    tpu.vector_store %arg13[%c7_94, %c0_95], %133 {strides = array<i32>} : memref<12x12xf32, #tpu.memory_space<vmem>>, vector<1x12xf32>,
    %135 = vector.extract_strided_slice %107 {offsets = [0, 0], sizes = [1, 12], strides = [1, 1]} : vector<2x12xf32> to vector<1x12xf32>
    %c8_96 = arith.constant 8 : index
    %c0_97 = arith.constant 0 : index
    %136 = vector.load %arg13[%c8_96, %c0_97] : memref<12x12xf32, #tpu.memory_space<vmem>>, vector<1x12xf32>
    tpu.vector_store %arg13[%c8_96, %c0_97], %135 {strides = array<i32>} : memref<12x12xf32, #tpu.memory_space<vmem>>, vector<1x12xf32>,
    %137 = vector.extract_strided_slice %110 {offsets = [0, 0], sizes = [1, 12], strides = [1, 1]} : vector<2x12xf32> to vector<1x12xf32>
    %c9_98 = arith.constant 9 : index
    %c0_99 = arith.constant 0 : index
    %138 = vector.load %arg13[%c9_98, %c0_99] : memref<12x12xf32, #tpu.memory_space<vmem>>, vector<1x12xf32>
    tpu.vector_store %arg13[%c9_98, %c0_99], %137 {strides = array<i32>} : memref<12x12xf32, #tpu.memory_space<vmem>>, vector<1x12xf32>,
    %139 = vector.extract_strided_slice %113 {offsets = [0, 0], sizes = [1, 12], strides = [1, 1]} : vector<2x12xf32> to vector<1x12xf32>
    %c10_100 = arith.constant 10 : index
    %c0_101 = arith.constant 0 : index
    %140 = vector.load %arg13[%c10_100, %c0_101] : memref<12x12xf32, #tpu.memory_space<vmem>>, vector<1x12xf32>
    tpu.vector_store %arg13[%c10_100, %c0_101], %139 {strides = array<i32>} : memref<12x12xf32, #tpu.memory_space<vmem>>, vector<1x12xf32>,
    %141 = vector.extract_strided_slice %116 {offsets = [0, 0], sizes = [1, 12], strides = [1, 1]} : vector<2x12xf32> to vector<1x12xf32>
    %c11_102 = arith.constant 11 : index
    %c0_103 = arith.constant 0 : index
    %142 = vector.load %arg13[%c11_102, %c0_103] : memref<12x12xf32, #tpu.memory_space<vmem>>, vector<1x12xf32>
    tpu.vector_store %arg13[%c11_102, %c0_103], %141 {strides = array<i32>} : memref<12x12xf32, #tpu.memory_space<vmem>>, vector<1x12xf32>,
    %c0_104 = arith.constant 0 : index
    %c0_105 = arith.constant 0 : index
    %143 = vector.load %arg13[%c0_104, %c0_105] : memref<12x12xf32, #tpu.memory_space<vmem>>, vector<12x12xf32>
    %144 = vector.extract_strided_slice %52 {offsets = [0, 0], sizes = [1, 12], strides = [1, 1]} : vector<2x12xf32> to vector<1x12xf32>
    %cst_106 = arith.constant dense<0.000000e+00> : vector<1x12xf32>
    %145 = tpu.matmul %144, %143, %cst_106 {dimension_numbers = #tpu.dot_dimension_numbers<[1], [0], [0], [1], [0, 0, 1, 1], [], []>} : vector<1x12xf32>, vector<12x12xf32>, vector<1x12xf32> -> vector<1x12xf32>
    %c0_107 = arith.constant 0 : index
    %c0_108 = arith.constant 0 : index
    %146 = vector.load %arg12[%c0_107, %c0_108] : memref<8x12xf32, #tpu.memory_space<vmem>>, vector<1x12xf32>
    tpu.vector_store %arg12[%c0_107, %c0_108], %145 {strides = array<i32>} : memref<8x12xf32, #tpu.memory_space<vmem>>, vector<1x12xf32>,
    %cst_109 = arith.constant dense<0.000000e+00> : vector<1x12xf32>
    %147 = tpu.matmul %145, %143, %cst_109 {dimension_numbers = #tpu.dot_dimension_numbers<[1], [0], [0], [1], [0, 0, 1, 1], [], []>} : vector<1x12xf32>, vector<12x12xf32>, vector<1x12xf32> -> vector<1x12xf32>
    %c1_110 = arith.constant 1 : index
    %c0_111 = arith.constant 0 : index
    %148 = vector.load %arg12[%c1_110, %c0_111] : memref<8x12xf32, #tpu.memory_space<vmem>>, vector<1x12xf32>
    tpu.vector_store %arg12[%c1_110, %c0_111], %147 {strides = array<i32>} : memref<8x12xf32, #tpu.memory_space<vmem>>, vector<1x12xf32>,
    %cst_112 = arith.constant dense<0.000000e+00> : vector<1x12xf32>
    %149 = tpu.matmul %147, %143, %cst_112 {dimension_numbers = #tpu.dot_dimension_numbers<[1], [0], [0], [1], [0, 0, 1, 1], [], []>} : vector<1x12xf32>, vector<12x12xf32>, vector<1x12xf32> -> vector<1x12xf32>
    %c2_113 = arith.constant 2 : index
    %c0_114 = arith.constant 0 : index
    %150 = vector.load %arg12[%c2_113, %c0_114] : memref<8x12xf32, #tpu.memory_space<vmem>>, vector<1x12xf32>
    tpu.vector_store %arg12[%c2_113, %c0_114], %149 {strides = array<i32>} : memref<8x12xf32, #tpu.memory_space<vmem>>, vector<1x12xf32>,
    %cst_115 = arith.constant dense<0.000000e+00> : vector<1x12xf32>
    %151 = tpu.matmul %149, %143, %cst_115 {dimension_numbers = #tpu.dot_dimension_numbers<[1], [0], [0], [1], [0, 0, 1, 1], [], []>} : vector<1x12xf32>, vector<12x12xf32>, vector<1x12xf32> -> vector<1x12xf32>
    %c3_116 = arith.constant 3 : index
    %c0_117 = arith.constant 0 : index
    %152 = vector.load %arg12[%c3_116, %c0_117] : memref<8x12xf32, #tpu.memory_space<vmem>>, vector<1x12xf32>
    tpu.vector_store %arg12[%c3_116, %c0_117], %151 {strides = array<i32>} : memref<8x12xf32, #tpu.memory_space<vmem>>, vector<1x12xf32>,
    %153 = vector.extract_strided_slice %35 {offsets = [6, 0], sizes = [4, 12], strides = [1, 1]} : vector<10x12xf32> to vector<4x12xf32>
    %c4_118 = arith.constant 4 : index
    %c0_119 = arith.constant 0 : index
    %154 = vector.load %arg11[%c4_118, %c0_119] : memref<8x12xf32, #tpu.memory_space<vmem>>, vector<4x12xf32>
    tpu.vector_store %arg11[%c4_118, %c0_119], %153 {strides = array<i32>} : memref<8x12xf32, #tpu.memory_space<vmem>>, vector<4x12xf32>,
    %155 = vector.extract_strided_slice %83 {offsets = [1, 0], sizes = [1, 12], strides = [1, 1]} : vector<2x12xf32> to vector<1x12xf32>
    %c0_120 = arith.constant 0 : index
    %c0_121 = arith.constant 0 : index
    %156 = vector.load %arg13[%c0_120, %c0_121] : memref<12x12xf32, #tpu.memory_space<vmem>>, vector<1x12xf32>
    tpu.vector_store %arg13[%c0_120, %c0_121], %155 {strides = array<i32>} : memref<12x12xf32, #tpu.memory_space<vmem>>, vector<1x12xf32>,
    %157 = vector.extract_strided_slice %86 {offsets = [1, 0], sizes = [1, 12], strides = [1, 1]} : vector<2x12xf32> to vector<1x12xf32>
    %c1_122 = arith.constant 1 : index
    %c0_123 = arith.constant 0 : index
    %158 = vector.load %arg13[%c1_122, %c0_123] : memref<12x12xf32, #tpu.memory_space<vmem>>, vector<1x12xf32>
    tpu.vector_store %arg13[%c1_122, %c0_123], %157 {strides = array<i32>} : memref<12x12xf32, #tpu.memory_space<vmem>>, vector<1x12xf32>,
    %159 = vector.extract_strided_slice %89 {offsets = [1, 0], sizes = [1, 12], strides = [1, 1]} : vector<2x12xf32> to vector<1x12xf32>
    %c2_124 = arith.constant 2 : index
    %c0_125 = arith.constant 0 : index
    %160 = vector.load %arg13[%c2_124, %c0_125] : memref<12x12xf32, #tpu.memory_space<vmem>>, vector<1x12xf32>
    tpu.vector_store %arg13[%c2_124, %c0_125], %159 {strides = array<i32>} : memref<12x12xf32, #tpu.memory_space<vmem>>, vector<1x12xf32>,
    %161 = vector.extract_strided_slice %92 {offsets = [1, 0], sizes = [1, 12], strides = [1, 1]} : vector<2x12xf32> to vector<1x12xf32>
    %c3_126 = arith.constant 3 : index
    %c0_127 = arith.constant 0 : index
    %162 = vector.load %arg13[%c3_126, %c0_127] : memref<12x12xf32, #tpu.memory_space<vmem>>, vector<1x12xf32>
    tpu.vector_store %arg13[%c3_126, %c0_127], %161 {strides = array<i32>} : memref<12x12xf32, #tpu.memory_space<vmem>>, vector<1x12xf32>,
    %163 = vector.extract_strided_slice %95 {offsets = [1, 0], sizes = [1, 12], strides = [1, 1]} : vector<2x12xf32> to vector<1x12xf32>
    %c4_128 = arith.constant 4 : index
    %c0_129 = arith.constant 0 : index
    %164 = vector.load %arg13[%c4_128, %c0_129] : memref<12x12xf32, #tpu.memory_space<vmem>>, vector<1x12xf32>
    tpu.vector_store %arg13[%c4_128, %c0_129], %163 {strides = array<i32>} : memref<12x12xf32, #tpu.memory_space<vmem>>, vector<1x12xf32>,
    %165 = vector.extract_strided_slice %98 {offsets = [1, 0], sizes = [1, 12], strides = [1, 1]} : vector<2x12xf32> to vector<1x12xf32>
    %c5_130 = arith.constant 5 : index
    %c0_131 = arith.constant 0 : index
    %166 = vector.load %arg13[%c5_130, %c0_131] : memref<12x12xf32, #tpu.memory_space<vmem>>, vector<1x12xf32>
    tpu.vector_store %arg13[%c5_130, %c0_131], %165 {strides = array<i32>} : memref<12x12xf32, #tpu.memory_space<vmem>>, vector<1x12xf32>,
    %167 = vector.extract_strided_slice %101 {offsets = [1, 0], sizes = [1, 12], strides = [1, 1]} : vector<2x12xf32> to vector<1x12xf32>
    %c6_132 = arith.constant 6 : index
    %c0_133 = arith.constant 0 : index
    %168 = vector.load %arg13[%c6_132, %c0_133] : memref<12x12xf32, #tpu.memory_space<vmem>>, vector<1x12xf32>
    tpu.vector_store %arg13[%c6_132, %c0_133], %167 {strides = array<i32>} : memref<12x12xf32, #tpu.memory_space<vmem>>, vector<1x12xf32>,
    %169 = vector.extract_strided_slice %104 {offsets = [1, 0], sizes = [1, 12], strides = [1, 1]} : vector<2x12xf32> to vector<1x12xf32>
    %c7_134 = arith.constant 7 : index
    %c0_135 = arith.constant 0 : index
    %170 = vector.load %arg13[%c7_134, %c0_135] : memref<12x12xf32, #tpu.memory_space<vmem>>, vector<1x12xf32>
    tpu.vector_store %arg13[%c7_134, %c0_135], %169 {strides = array<i32>} : memref<12x12xf32, #tpu.memory_space<vmem>>, vector<1x12xf32>,
    %171 = vector.extract_strided_slice %107 {offsets = [1, 0], sizes = [1, 12], strides = [1, 1]} : vector<2x12xf32> to vector<1x12xf32>
    %c8_136 = arith.constant 8 : index
    %c0_137 = arith.constant 0 : index
    %172 = vector.load %arg13[%c8_136, %c0_137] : memref<12x12xf32, #tpu.memory_space<vmem>>, vector<1x12xf32>
    tpu.vector_store %arg13[%c8_136, %c0_137], %171 {strides = array<i32>} : memref<12x12xf32, #tpu.memory_space<vmem>>, vector<1x12xf32>,
    %173 = vector.extract_strided_slice %110 {offsets = [1, 0], sizes = [1, 12], strides = [1, 1]} : vector<2x12xf32> to vector<1x12xf32>
    %c9_138 = arith.constant 9 : index
    %c0_139 = arith.constant 0 : index
    %174 = vector.load %arg13[%c9_138, %c0_139] : memref<12x12xf32, #tpu.memory_space<vmem>>, vector<1x12xf32>
    tpu.vector_store %arg13[%c9_138, %c0_139], %173 {strides = array<i32>} : memref<12x12xf32, #tpu.memory_space<vmem>>, vector<1x12xf32>,
    %175 = vector.extract_strided_slice %113 {offsets = [1, 0], sizes = [1, 12], strides = [1, 1]} : vector<2x12xf32> to vector<1x12xf32>
    %c10_140 = arith.constant 10 : index
    %c0_141 = arith.constant 0 : index
    %176 = vector.load %arg13[%c10_140, %c0_141] : memref<12x12xf32, #tpu.memory_space<vmem>>, vector<1x12xf32>
    tpu.vector_store %arg13[%c10_140, %c0_141], %175 {strides = array<i32>} : memref<12x12xf32, #tpu.memory_space<vmem>>, vector<1x12xf32>,
    %177 = vector.extract_strided_slice %116 {offsets = [1, 0], sizes = [1, 12], strides = [1, 1]} : vector<2x12xf32> to vector<1x12xf32>
    %c11_142 = arith.constant 11 : index
    %c0_143 = arith.constant 0 : index
    %178 = vector.load %arg13[%c11_142, %c0_143] : memref<12x12xf32, #tpu.memory_space<vmem>>, vector<1x12xf32>
    tpu.vector_store %arg13[%c11_142, %c0_143], %177 {strides = array<i32>} : memref<12x12xf32, #tpu.memory_space<vmem>>, vector<1x12xf32>,
    %c0_144 = arith.constant 0 : index
    %c0_145 = arith.constant 0 : index
    %179 = vector.load %arg13[%c0_144, %c0_145] : memref<12x12xf32, #tpu.memory_space<vmem>>, vector<12x12xf32>
    %180 = vector.extract_strided_slice %52 {offsets = [1, 0], sizes = [1, 12], strides = [1, 1]} : vector<2x12xf32> to vector<1x12xf32>
    %cst_146 = arith.constant dense<0.000000e+00> : vector<1x12xf32>
    %181 = tpu.matmul %180, %179, %cst_146 {dimension_numbers = #tpu.dot_dimension_numbers<[1], [0], [0], [1], [0, 0, 1, 1], [], []>} : vector<1x12xf32>, vector<12x12xf32>, vector<1x12xf32> -> vector<1x12xf32>
    %c4_147 = arith.constant 4 : index
    %c0_148 = arith.constant 0 : index
    %182 = vector.load %arg12[%c4_147, %c0_148] : memref<8x12xf32, #tpu.memory_space<vmem>>, vector<1x12xf32>
    tpu.vector_store %arg12[%c4_147, %c0_148], %181 {strides = array<i32>} : memref<8x12xf32, #tpu.memory_space<vmem>>, vector<1x12xf32>,
    %cst_149 = arith.constant dense<0.000000e+00> : vector<1x12xf32>
    %183 = tpu.matmul %181, %179, %cst_149 {dimension_numbers = #tpu.dot_dimension_numbers<[1], [0], [0], [1], [0, 0, 1, 1], [], []>} : vector<1x12xf32>, vector<12x12xf32>, vector<1x12xf32> -> vector<1x12xf32>
    %c5_150 = arith.constant 5 : index
    %c0_151 = arith.constant 0 : index
    %184 = vector.load %arg12[%c5_150, %c0_151] : memref<8x12xf32, #tpu.memory_space<vmem>>, vector<1x12xf32>
    tpu.vector_store %arg12[%c5_150, %c0_151], %183 {strides = array<i32>} : memref<8x12xf32, #tpu.memory_space<vmem>>, vector<1x12xf32>,
    %cst_152 = arith.constant dense<0.000000e+00> : vector<1x12xf32>
    %185 = tpu.matmul %183, %179, %cst_152 {dimension_numbers = #tpu.dot_dimension_numbers<[1], [0], [0], [1], [0, 0, 1, 1], [], []>} : vector<1x12xf32>, vector<12x12xf32>, vector<1x12xf32> -> vector<1x12xf32>
    %c6_153 = arith.constant 6 : index
    %c0_154 = arith.constant 0 : index
    %186 = vector.load %arg12[%c6_153, %c0_154] : memref<8x12xf32, #tpu.memory_space<vmem>>, vector<1x12xf32>
    tpu.vector_store %arg12[%c6_153, %c0_154], %185 {strides = array<i32>} : memref<8x12xf32, #tpu.memory_space<vmem>>, vector<1x12xf32>,
    %cst_155 = arith.constant dense<0.000000e+00> : vector<1x12xf32>
    %187 = tpu.matmul %185, %179, %cst_155 {dimension_numbers = #tpu.dot_dimension_numbers<[1], [0], [0], [1], [0, 0, 1, 1], [], []>} : vector<1x12xf32>, vector<12x12xf32>, vector<1x12xf32> -> vector<1x12xf32>
    %c7_156 = arith.constant 7 : index
    %c0_157 = arith.constant 0 : index
    %188 = vector.load %arg12[%c7_156, %c0_157] : memref<8x12xf32, #tpu.memory_space<vmem>>, vector<1x12xf32>
    tpu.vector_store %arg12[%c7_156, %c0_157], %187 {strides = array<i32>} : memref<8x12xf32, #tpu.memory_space<vmem>>, vector<1x12xf32>,
    return
  }
  func.func @transform_0(%arg0: i32) -> (i32, i32) {
    %c0_i32 = arith.constant 0 : i32
    %c0_i32_0 = arith.constant 0 : i32
    %c0_i32_1 = arith.constant 0 : i32
    return %c0_i32, %c0_i32_0 : i32, i32
  }
  func.func @transform_1(%arg0: i32) -> (i32, i32) {
    %c0_i32 = arith.constant 0 : i32
    %c0_i32_0 = arith.constant 0 : i32
    %c0_i32_1 = arith.constant 0 : i32
    return %c0_i32, %c0_i32_0 : i32, i32
  }
  func.func @transform_2(%arg0: i32) -> (i32, i32) {
    %c0_i32 = arith.constant 0 : i32
    %c0_i32_0 = arith.constant 0 : i32
    %c0_i32_1 = arith.constant 0 : i32
    return %c0_i32, %c0_i32_0 : i32, i32
  }
  func.func @transform_3(%arg0: i32) -> (i32, i32) {
    %c0_i32 = arith.constant 0 : i32
    %c0_i32_0 = arith.constant 0 : i32
    %c0_i32_1 = arith.constant 0 : i32
    return %c0_i32, %c0_i32_0 : i32, i32
  }
  func.func @transform_4(%arg0: i32) -> (i32, i32) {
    %c0_i32 = arith.constant 0 : i32
    %c0_i32_0 = arith.constant 0 : i32
    %c0_i32_1 = arith.constant 0 : i32
    return %c0_i32, %c0_i32_0 : i32, i32
  }
  func.func @transform_5(%arg0: i32) -> (i32, i32) {
    %c0_i32 = arith.constant 0 : i32
    %c0_i32_0 = arith.constant 0 : i32
    %c0_i32_1 = arith.constant 0 : i32
    return %c0_i32, %c0_i32_0 : i32, i32
  }
  func.func @transform_6(%arg0: i32) -> (i32, i32) {
    %c0_i32 = arith.constant 0 : i32
    %c0_i32_0 = arith.constant 0 : i32
    %c0_i32_1 = arith.constant 0 : i32
    return %c0_i32, %c0_i32_0 : i32, i32
  }
  func.func @transform_7(%arg0: i32) -> (i32, i32, i32) {
    %c0_i32 = arith.constant 0 : i32
    %c0_i32_0 = arith.constant 0 : i32
    %c0_i32_1 = arith.constant 0 : i32
    %c0_i32_2 = arith.constant 0 : i32
    return %c0_i32, %c0_i32_0, %c0_i32_1 : i32, i32, i32
  }
  func.func @transform_8(%arg0: i32) -> (i32, i32) {
    %c0_i32 = arith.constant 0 : i32
    %c0_i32_0 = arith.constant 0 : i32
    %c0_i32_1 = arith.constant 0 : i32
    return %c0_i32, %c0_i32_0 : i32, i32
  }
  func.func @transform_9(%arg0: i32) -> (i32, i32) {
    %c0_i32 = arith.constant 0 : i32
    %c0_i32_0 = arith.constant 0 : i32
    %c0_i32_1 = arith.constant 0 : i32
    return %c0_i32, %c0_i32_0 : i32, i32
  }
  func.func @transform_10(%arg0: i32) -> (i32, i32) {
    %c0_i32 = arith.constant 0 : i32
    %c0_i32_0 = arith.constant 0 : i32
    %c0_i32_1 = arith.constant 0 : i32
    return %c0_i32, %c0_i32_0 : i32, i32
  }
  func.func @transform_11(%arg0: i32) -> (i32, i32) {
    %c0_i32 = arith.constant 0 : i32
    %c0_i32_0 = arith.constant 0 : i32
    %c0_i32_1 = arith.constant 0 : i32
    return %c0_i32, %c0_i32_0 : i32, i32
  }
}

</mosaic_0001>

<bundles_post_ra>
// kernel: denis_forward.1
= control target key start
LH: loop header
LB: loop body
LE: loop exit
PB: predicated region body
PF: predicated region fallthrough
CT: control target
= control target key end

     0   :  { %17 = vsyncpa [#allocation4], 0  ;;  %vm90_vm0 = vcmask 1043456   ;;  %vm41_vm1 = vcmask 31744   ;;  %vm43_vm2 = vcmask 25600   ;;  %s3264_s0 = inlined_call_operand.vmem [shape: f32[10,4], index: 0, kind: input, shape index: {}]   ;;  %s3265_s1 = inlined_call_operand.vmem [shape: f32[2,4], index: 1, kind: input, shape index: {}]   ;;  %s3266_s2 = inlined_call_operand.vmem [shape: f32[4,16], index: 2, kind: input, shape index: {}]   ;;  %s3267_s3 = inlined_call_operand.vmem [shape: f32[1,16], index: 3, kind: input, shape index: {}]   ;;  %s3268_s4 = inlined_call_operand.vmem [shape: f32[16,8], index: 4, kind: input, shape index: {}]   ;;  %s3269_s5 = inlined_call_operand.vmem [shape: f32[4,16], index: 5, kind: input, shape index: {}]   ;;  %s3270_s6 = inlined_call_operand.vmem [shape: f32[1,16], index: 6, kind: input, shape index: {}]   ;;  %s3271_s7 = inlined_call_operand.vmem [shape: f32[12,16,12], index: 7, kind: input, shape index: {}]   ;;  %s3272_s8 = inlined_call_operand.vmem [shape: f32[4,12], index: 8, kind: input, shape index: {}]   ;;  %s3273_s9 = inlined_call_operand.vmem [shape: f32[8,12], index: 9, kind: input, shape index: {}]   ;;  %s3274_s10 = inlined_call_operand.hbm [shape: f32[8,12], index: 10, kind: output, shape index: {0}]   ;;  %s3275_s11 = inlined_call_operand.hbm [shape: f32[8,12], index: 11, kind: output, shape index: {1}]  }
   0x1   :  { %v2920_v0 = vld [vmem:[%s3266_s2] sm:$0xf]  ;;  %v2930_v2 = vld [vmem:[%s3264_s0 + $0x8] sm:$0x3] }
   0x2   :  { %v2925_v1 = vld [vmem:[%s3264_s0] sm:$0xff]  ;;  %2525 = vmatprep.subr.msk.mxu0 %vm90_vm0, %v2920_v0 }
   0x3   :  { %18 = vsyncpa [#allocation6], 0  ;;  %2526 = vmatpush3.msk.msra.mxu0 %vm90_vm0, %v2920_v0  ;;  %v42_v3 = vsel %vm41_vm1, %v2925_v1, 0.0  ;;  %v44_v4 = vsel %vm43_vm2, %v2930_v2, 0.0  ;;  %v72_v31 = vld [vmem:[%s3268_s4] sm:$0xff]  ;;  %v73_v32 = vld [vmem:[%s3268_s4 + $0x8] sm:$0xff] }
   0x4   :  { %v45_v5 = vadd.f32 %v44_v4, %v42_v3  ;;  %v2714_v33 = vpack.c.bf16 %v73_v32, %v72_v31  ;;  %v2851_v34 = vmov 0.0   ;;  %v2371_v35 = vld [vmem:[%s3267_s3] ss:$0 sm:$0xff]  ;;  %vm175_vm5 = vcmask 130048  }
   0x5   :  { %v2959_v36 = vld [vmem:[%s3265_s1] sm:$0x3]  ;;  %vm2852_vm6 = vmmov 0   ;;  %v2853_v48 = vmov 0.0|0.0   ;;  %vm257_vm7 = vcmask 64512   ;;  %vm2027_vm9 = vcmask 91136  }
   0x6   :  { %v46_v6 = vrot.slane %v45_v5, 4  ;;  %2715 = vmatprep.subr.bf16.mxu1 %v2714_v33  ;;  %v75_v47 = vld [vmem:[%s3273_s9] sm:$0xff]  ;;  %v721_v50 = vsel %vm43_vm2, %v2959_v36, 0.0  ;;  %vm1708_vm10 = vcmask 94209   ;;  %vm2025_vm11 = vcmask 97286  }
   0x7   :  { %2717 = vmatpush3.bf16.msra.mxu1 %v2714_v33  ;;  %2537 = vmatprep.subr.mxu0 %v75_v47  ;;  %v2978_v49 = vld [vmem:[%s3272_s8] sm:$0xf]  ;;  %v722_v51 = vrot.slane %v721_v50, 4  ;;  %vm1710_vm13 = vcmask 90112   ;;  %vm2029_vm14 = vcmask 91137   ;;  %vm2854_vm15 = vmmov 1  }
   0x8   :  { %v47_v7 = vadd.f32 %v46_v6, %v45_v5  ;;  %2547 = vmatprep.subr.mxu1 %v2851_v34 }
   0x9   :  { %v723_v52 = vadd.f32 %v722_v51, %v721_v50  ;;  %v2413_v50 = vld [vmem:[%s3271_s7 + $0x80] sm:$0xff]  ;;  %v2414_v51 = vld [vmem:[%s3271_s7 + $0x88] sm:$0xff] }
   0xa   :  { %v48_v8 = vrot.slane %v47_v7, 2 }
   0xb   :  { %v724_v53 = vrot.slane %v723_v52, 2 }
   0xc   :  { %v49_v9 = vadd.f32 %v48_v8, %v47_v7 }
   0xd   :  { %v725_v54 = vadd.f32 %v724_v53, %v723_v52  ;;  %v2746_v53 = vpack.c.bf16 %v2414_v51, %v2413_v50 }
   0xe   :  { %v50_v10 = vrot.slane %v49_v9, 1 }
   0xf   :  { %v726_v55 = vrot.slane %v725_v54, 1 }
  0x10   :  { %v51_v11 = vadd.f32 %v50_v10, %v49_v9 }
  0x11   :  { %v727_v56 = vadd.f32 %v726_v55, %v725_v54  ;;  %v2416_v54 = vld [vmem:[%s3271_s7 + $0x90] sm:$0xff]  ;;  %v2417_v55 = vld [vmem:[%s3271_s7 + $0x98] sm:$0xff] }
  0x12   :  { %v53_v12 = vmul.f32 0.1, %v51_v11 }
  0x13   :  { %v729_v57 = vmul.f32 0.5, %v727_v56  ;;  %v2419_v56 = vld [vmem:[%s3271_s7 + $0xa0] sm:$0xff] }
  0x14   :  { %v54_v13 = vsub.f32 %v2925_v1, %v53_v12  ;;  %v55_v14 = vsub.f32 %v2930_v2, %v53_v12  ;;  %v424_v41 = vsub.f32 %v2959_v36, %v53_v12 }
  0x15   :  { %v730_v58 = vsub.f32 %v2959_v36, %v729_v57  ;;  %v2420_v57 = vld [vmem:[%s3271_s7 + $0xa8] sm:$0xff] }
  0x16   :  { %v56_v15 = vmul.f32 %v54_v13, %v54_v13  ;;  %v57_v16 = vmul.f32 %v55_v14, %v55_v14 }
  0x17   :  { %v731_v59 = vmul.f32 %v730_v58, %v730_v58 }
  0x18   :  { %v58_v17 = vsel %vm41_vm1, %v56_v15, 0.0  ;;  %v59_v18 = vsel %vm43_vm2, %v57_v16, 0.0 }
  0x19   :  { %v60_v19 = vadd.f32 %v59_v18, %v58_v17  ;;  %v732_v60 = vsel %vm43_vm2, %v731_v59, 0.0  ;;  %v2752_v59 = vpack.c.bf16 %v2420_v57, %v2419_v56  ;;  %vm1725_vm2 = vcmask 97280  }
  0x1a   :  { %v733_v61 = vrot.slane %v732_v60, 4 }
  0x1b   :  { %v61_v20 = vrot.slane %v60_v19, 4 }
  0x1c   :  { %v734_v62 = vadd.f32 %v733_v61, %v732_v60  ;;  %v2422_v60 = vld [vmem:[%s3271_s7 + $0xb0] sm:$0xff]  ;;  %v2423_v61 = vld [vmem:[%s3271_s7 + $0xb8] sm:$0xff] }
  0x1d   :  { %v62_v21 = vadd.f32 %v61_v20, %v60_v19 }
  0x1e   :  { %v735_v63 = vrot.slane %v734_v62, 2 }
  0x1f   :  { %v63_v22 = vrot.slane %v62_v21, 2 }
  0x21   :  { %v64_v23 = vadd.f32 %v63_v22, %v62_v21  ;;  %v2388_v22 = vld [vmem:[%s3270_s6] ss:$0 sm:$0xff] }
  0x23   :  { %v65_v24 = vrot.slane %v64_v23, 1 }
  0x25   :  { %v66_v25 = vadd.f32 %v65_v24, %v64_v23  ;;  %v2392_v23 = vld [vmem:[%s3271_s7 + $0x10] sm:$0xff]  ;;  %v2393_v24 = vld [vmem:[%s3271_s7 + $0x18] sm:$0xff] }
  0x27   :  { %v67_v26 = vmul.f32 0.1, %v66_v25 }
  0x29   :  { %v68_v27 = vadd.f32 1e-05, %v67_v26  ;;  %v2395_v26 = vld [vmem:[%s3271_s7 + $0x20] sm:$0xff] }
  0x2b   :  { %2799 = vrsqrt.f32 %v68_v27  ;;  %v2396_v27 = vld [vmem:[%s3271_s7 + $0x28] sm:$0xff] }
  0x2c   :  { %v2728_v32 = vpack.c.bf16 %v2396_v27, %v2395_v26 }
  0x35   :  { %v2800_v28 = vpop.eup %2799 }
  0x36   :  { %v76_v29 = vmul.f32 %v2800_v28, %v54_v13  ;;  %v77_v30 = vmul.f32 %v2800_v28, %v55_v14  ;;  %v425_v46 = vmul.f32 %v2800_v28, %v424_v41  ;;  %v743_v14 = vld [vmem:[%s3269_s5] sm:$0xf] }
  0x38   :  { %2527 = vmatprep.mubr.msk.f32.mxu0 %vm41_vm1, %v76_v29 }
  0x39   :  { %2528 = vmatmul.mubr.msk.f32.vlgmr.msra.gmra.mrb[0].mxu0 %vm41_vm1, %v77_v30  ;;  %v2725_v30 = vpack.c.bf16 %v2393_v24, %v2392_v23 }
  0x3a   :  { %2538 = vmatpush3.msra.mxu0 %v75_v47 }
  0x3b   :  { %2542 = vmatprep.subr.msk.mxu0 %vm90_vm0, %v2978_v49 }
 0x10c   :  { %v2529_v37 = vpop.f32.mrb[0].mxu0 }
 0x10d   :  { %v166_v38 = vadd.f32 %v2529_v37, %v2371_v35  ;;  %v160_v39 = vpop.f32.mrb[1].mxu0  ;;  %v2401_v37 = vld [vmem:[%s3271_s7 + $0x40] sm:$0xff] }
 0x10e   :  { %v161_v40 = vadd.f32 %v2371_v35, %v160_v39 }
 0x10f   :  { %v172_v42 = vmul.f32 0.01, %v166_v38  ;;  %vm170_vm3 = vcmp.ge.f32.partialorder %v166_v38, 0.0 }
 0x110   :  { %vm169_vm4 = vcmp.ge.f32.partialorder %v161_v40, 0.0  ;;  %v171_v43 = vmul.f32 0.01, %v161_v40 }
 0x111   :  { %v174_v45 = vsel %vm170_vm3, %v166_v38, %v172_v42  ;;  %v2402_v38 = vld [vmem:[%s3271_s7 + $0x48] sm:$0xff]  ;;  %v2404_v42 = vld [vmem:[%s3271_s7 + $0x50] sm:$0xff] }
 0x112   :  { %v173_v44 = vsel %vm169_vm4, %v161_v40, %v171_v43  ;;  %v2734_v41 = vpack.c.bf16 %v2402_v38, %v2401_v37  ;;  %v2405_v43 = vld [vmem:[%s3271_s7 + $0x58] sm:$0xff] }
 0x113   :  { %2534 = vmatprep.mubr.msk.f32.mxu1 %vm175_vm5, %v173_v44  ;;  %v2408_v44 = vld [vmem:[%s3271_s7 + $0x68] sm:$0xff] }
 0x114   :  { %2535 = vmatmul.mubr.msk.f32.vlgmr.msra.gmra.mrb[0].mxu1 %vm175_vm5, %v174_v45  ;;  %v2737_v45 = vpack.c.bf16 %v2405_v43, %v2404_v42 }
 0x115   :  { %2548 = vmatpush3.msk.msra.mxu1 %vm90_vm0, %v2920_v0  ;;  %2549 = vmatprep.mubr.msk.f32.mxu1 %vm2852_vm6, %v2851_v34  ;;  %v736_v0 = vadd.f32 %v735_v63, %v734_v62  ;;  %v2755_v62 = vpack.c.bf16 %v2423_v61, %v2422_v60 }
 0x116   :  { %2718 = vmatprep.subr.bf16.mxu1 %v2853_v48 }
 0x117   :  { %v737_v3 = vrot.slane %v736_v0, 1 }
 0x118   :  { %2550 = vmatmul.mubr.msk.f32.vlgmr.msra.gmra.mrb[2].mxu1 %vm41_vm1, %v425_v46 }
 0x119   :  { %2556 = vmatprep.mubr.msk.f32.mxu1 %vm2852_vm6, %v2851_v34  ;;  %2720 = vmatpush3.bf16.msra.mxu1 %v2714_v33  ;;  %v738_v4 = vadd.f32 %v737_v3, %v736_v0  ;;  %v2398_v33 = vld [vmem:[%s3271_s7 + $0x30] sm:$0xff] }
 0x11a   :  { %2569 = vmatprep.subr.mxu1 %v2851_v34 }
 0x11b   :  { %v739_v5 = vmul.f32 0.5, %v738_v4 }
 0x11d   :  { %v740_v6 = vadd.f32 1e-05, %v739_v5 }
 0x11f   :  { %2801 = vrsqrt.f32 %v740_v6 }
 0x129   :  { %v2802_v12 = vpop.eup %2801 }
 0x12a   :  { %v742_v16 = vmul.f32 %v2802_v12, %v730_v58  ;;  %v2749_v58 = vpack.c.bf16 %v2417_v55, %v2416_v54 }
 0x1e7   :  { %v2536_v7 = vpop.f32.mrb[0].mxu1 }
 0x1e8   :  { %v248_v8 = vpop.f32.mrb[1].mxu1 }
 0x1e9   :  { %2539 = vmatprep.mubr.msk.f32.mxu0 %vm257_vm7, %v248_v8 }
 0x1ea   :  { %2540 = vmatmul.mubr.msk.f32.vlgmr.msra.gmra.mrb[2].mxu0 %vm257_vm7, %v2536_v7 }
 0x1eb   :  { %v495_v9 = vpop.f32.mrb[2].mxu1  ;;  %2543 = vmatpush3.msk.msra.mxu0 %vm90_vm0, %v2978_v49  ;;  %2544 = vmatprep.mubr.msk.f32.mxu0 %vm41_vm1, %v2925_v1  ;;  %v830_v1 = vld [vmem:[%s3271_s7] sm:$0xff] }
 0x1ec   :  { %v496_v10 = vadd.f32 %v2371_v35, %v495_v9  ;;  %v2551_v11 = vpop.f32.mrb[3].mxu1  ;;  %2559 = vmatprep.subr.mxu0 %v2851_v34  ;;  %v2399_v35 = vld [vmem:[%s3271_s7 + $0x38] sm:$0xff] }
 0x1ed   :  { %v2731_v40 = vpack.c.bf16 %v2399_v35, %v2398_v33 }
 0x1ee   :  { %vm499_vm8 = vcmp.ge.f32.partialorder %v496_v10, 0.0  ;;  %v500_v13 = vmul.f32 0.01, %v496_v10 }
 0x1f0   :  { %v501_v15 = vsel %vm499_vm8, %v496_v10, %v500_v13 }
 0x1f1   :  { %2557 = vmatmul.mubr.msk.f32.vlgmr.msra.gmra.mrb[4].mxu1 %vm175_vm5, %v501_v15 }
 0x1f2   :  { %2545 = vmatmul.mubr.msk.f32.vlgmr.msra.gmra.mrb[2].mxu0 %vm41_vm1, %v2930_v2  ;;  %2570 = vmatpush3.msk.msra.mxu1 %vm90_vm0, %v743_v14  ;;  %v831_v2 = vld [vmem:[%s3271_s7 + $0x8] sm:$0xff] }
 0x1f3   :  { %2571 = vmatprep.mubr.msk.f32.mxu1 %vm2852_vm6, %v2851_v34  ;;  %2560 = vmatpush3.msra.mxu0 %v75_v47  ;;  %v2722_v17 = vpack.c.bf16 %v831_v2, %v830_v1  ;;  %v2410_v47 = vld [vmem:[%s3271_s7 + $0x70] sm:$0xff] }
 0x1f4   :  { %2561 = vmatprep.mubr.msk.f32.mxu0 %vm2852_vm6, %v2851_v34  ;;  %2564 = vmatprep.subr.mxu0 %v2851_v34 }
 0x1f5   :  { %2572 = vmatmul.mubr.msk.f32.vlgmr.msra.gmra.mrb[6].mxu1 %vm41_vm1, %v742_v16  ;;  %2721 = vmatprep.subr.bf16.mxu1 %v2853_v48 }
 0x1f6   :  { %2578 = vmatprep.mubr.msk.f32.mxu1 %vm2852_vm6, %v2851_v34  ;;  %2723 = vmatpush3.bf16.msra.mxu1 %v2722_v17 }
 0x1f7   :  { %2727 = vmatprep.subr.bf16.mxu1 %v2853_v48 }
 0x2c4   :  { %v571_v18 = vpop.f32.mrb[4].mxu1 }
 0x2c5   :  { %v2546_v19 = vpop.f32.mrb[2].mxu0  ;;  %v2558_v20 = vpop.f32.mrb[5].mxu1  ;;  %2562 = vmatmul.mubr.msk.f32.vlgmr.msra.gmra.mrb[4].mxu0 %vm257_vm7, %v571_v18 }
 0x2c6   :  { %2028 = vst.msk [vmem:[#allocation3 + $0x6] sm:$0x3] %vm2027_vm9, %v2546_v19  ;;  %v414_v21 = vpop.f32.mrb[3].mxu0  ;;  %2565 = vmatpush3.msk.msra.mxu0 %vm90_vm0, %v2978_v49  ;;  %2566 = vmatprep.mubr.msk.f32.mxu0 %vm2852_vm6, %v2851_v34  ;;  %v2411_v49 = vld [vmem:[%s3271_s7 + $0x78] sm:$0xff] }
 0x2c7   :  { %1709 = vst.msk [vmem:[#allocation3 - $0x1] sm:$0x1e] %vm1708_vm10, %v414_v21  ;;  %2724 = vmatprep.subr.bf16.mxu0 %v2853_v48  ;;  %v2743_v52 = vpack.c.bf16 %v2411_v49, %v2410_v47 }
 0x2c8   :  { %2026 = vst.msk [vmem:[#allocation3 - $0x2] sm:$0xc0] %vm2025_vm11, %v414_v21  ;;  %v823_v25 = vpop.f32.mrb[6].mxu1 }
 0x2c9   :  { %v824_v28 = vadd.f32 %v2388_v22, %v823_v25  ;;  %v2573_v29 = vpop.f32.mrb[7].mxu1 }
 0x2cb   :  { %vm827_vm12 = vcmp.ge.f32.partialorder %v824_v28, 0.0  ;;  %v828_v31 = vmul.f32 0.01, %v824_v28 }
 0x2cd   :  { %v3050_v39 = vsel %vm827_vm12, %v824_v28, %v828_v31  ;;  %2567 = vmatmul.mubr.msk.f32.vlgmr.msra.gmra.mrb[4].mxu0 %vm41_vm1, %v2959_v36  ;;  %v2407_v36 = vld [vmem:[%s3271_s7 + $0x60] sm:$0xff]  ;;  %vm3180_vm1 = vmpackc.low %vm90_vm0, %vm2854_vm15  ;;  %s2855_s7 = smov [#allocation3]  }
 0x2ce   :  { %2579 = vmatmul.mubr.msk.f32.vlgmr.msra.gmra.mrb[8].mxu1 %vm175_vm5, %v3050_v39  ;;  %2726 = vmatpush3.bf16.msra.mxu0 %v2725_v30  ;;  %v2740_v46 = vpack.c.bf16 %v2408_v44, %v2407_v36  ;;  %s2349_s1 = sshll.u32 %s2855_s7, 4  ;;  %s2350_s1 = int_to_ptr.vmem [resolvable:$true] %s2349_s1 }
 0x2cf   :  { %2729 = vmatpush3.bf16.msra.mxu1 %v2728_v32  ;;  %2585 = vmatprep.mubr.msk.f32.mxu0 %vm2852_vm6, %v2851_v34  ;;  %s2803_s3 = scalar_lea.vmem %s2350_s1, 128  ;;  %p2808_p1 = scmp.lt.s32.totalorder %s2350_s1, %s2350_s1 }
 0x2d0   :  { %2592 = vmatprep.mubr.msk.f32.mxu1 %vm2852_vm6, %v2851_v34  ;;  %2730 = vmatprep.subr.bf16.mxu0 %v2853_v48  ;;  %p2804_p0 = scmp.ne.s32.totalorder %s2350_s1, %s2803_s3  ;;  %p2809_p2 = scmp.lt.s32.totalorder %s2803_s3, %s2803_s3 }
 0x2d1   :  { %2586 = vmatmul.mubr.msk.f32.vlgmr.msra.gmra.mrb[6].mxu0 %vm175_vm5, %v3050_v39  ;;  %2733 = vmatprep.subr.bf16.mxu1 %v2853_v48 }
 0x2d2   :  { %2593 = vmatmul.mubr.msk.f32.vlgmr.msra.gmra.mrb[10].mxu1 %vm175_vm5, %v3050_v39  ;;  %2732 = vmatpush3.bf16.msra.mxu0 %v2731_v40  ;;  %p2810_p3 = por %p2809_p2, %p2808_p1 }
 0x2d3   :  { %2735 = vmatpush3.bf16.msra.mxu1 %v2734_v41  ;;  %2599 = vmatprep.mubr.msk.f32.mxu0 %vm2852_vm6, %v2851_v34 }
 0x2d4   :  { %2606 = vmatprep.mubr.msk.f32.mxu1 %vm2852_vm6, %v2851_v34  ;;  %2736 = vmatprep.subr.bf16.mxu0 %v2853_v48  ;;  %p2811_p4 = pnand %p2810_p3, %p2804_p0 }
 0x2d5   :  { %2600 = vmatmul.mubr.msk.f32.vlgmr.msra.gmra.mrb[8].mxu0 %vm175_vm5, %v3050_v39  ;;  %2739 = vmatprep.subr.bf16.mxu1 %v2853_v48 }
 0x2d6   :  { %2607 = vmatmul.mubr.msk.f32.vlgmr.msra.gmra.mrb[12].mxu1 %vm175_vm5, %v3050_v39  ;;  %2738 = vmatpush3.bf16.msra.mxu0 %v2737_v45 }
 0x2d7   :  { %2741 = vmatpush3.bf16.msra.mxu1 %v2740_v46  ;;  %2613 = vmatprep.mubr.msk.f32.mxu0 %vm2852_vm6, %v2851_v34 }
 0x2d8   :  { %2620 = vmatprep.mubr.msk.f32.mxu1 %vm2852_vm6, %v2851_v34  ;;  %2742 = vmatprep.subr.bf16.mxu0 %v2853_v48 }
 0x2d9   :  { %2614 = vmatmul.mubr.msk.f32.vlgmr.msra.gmra.mrb[10].mxu0 %vm175_vm5, %v3050_v39  ;;  %2745 = vmatprep.subr.bf16.mxu1 %v2853_v48 }
 0x2da   :  { %2621 = vmatmul.mubr.msk.f32.vlgmr.msra.gmra.mrb[14].mxu1 %vm175_vm5, %v3050_v39  ;;  %2744 = vmatpush3.bf16.msra.mxu0 %v2743_v52 }
 0x2db   :  { %2747 = vmatpush3.bf16.msra.mxu1 %v2746_v53  ;;  %2627 = vmatprep.mubr.msk.f32.mxu0 %vm2852_vm6, %v2851_v34 }
 0x2dc   :  { %2634 = vmatprep.mubr.msk.f32.mxu1 %vm2852_vm6, %v2851_v34  ;;  %2748 = vmatprep.subr.bf16.mxu0 %v2853_v48 }
 0x2dd   :  { %2628 = vmatmul.mubr.msk.f32.vlgmr.msra.gmra.mrb[12].mxu0 %vm175_vm5, %v3050_v39  ;;  %2751 = vmatprep.subr.bf16.mxu1 %v2853_v48 }
 0x2de   :  { %2635 = vmatmul.mubr.msk.f32.vlgmr.msra.gmra.mrb[16].mxu1 %vm175_vm5, %v3050_v39  ;;  %2750 = vmatpush3.bf16.msra.mxu0 %v2749_v58 }
 0x2df   :  { %2753 = vmatpush3.bf16.msra.mxu1 %v2752_v59  ;;  %2641 = vmatprep.mubr.msk.f32.mxu0 %vm2852_vm6, %v2851_v34 }
 0x2e0   :  { %2648 = vmatprep.mubr.msk.f32.mxu1 %vm2852_vm6, %v2851_v34  ;;  %2754 = vmatprep.subr.bf16.mxu0 %v2853_v48 }
 0x2e1   :  { %2642 = vmatmul.mubr.msk.f32.vlgmr.msra.gmra.mrb[14].mxu0 %vm175_vm5, %v3050_v39  ;;  %2757 = vmatprep.subr.bf16.mxu1 %v2853_v48 }
 0x2e2   :  { %2649 = vmatmul.mubr.msk.f32.vlgmr.msra.gmra.mrb[18].mxu1 %vm175_vm5, %v3050_v39  ;;  %2756 = vmatpush3.bf16.msra.mxu0 %v2755_v62 }
 0x2e3   :  { %2655 = vmatprep.mubr.msk.f32.mxu0 %vm2852_vm6, %v2851_v34  ;;  %2761 = vmatprep.subr.bf16.mxu0 %v2853_v48 }
 0x2e4   :  { %2662 = vmatprep.mubr.msk.f32.mxu1 %vm2852_vm6, %v2851_v34 }
 0x2e5   :  { %2656 = vmatmul.mubr.msk.f32.vlgmr.msra.gmra.mrb[16].mxu0 %vm175_vm5, %v3050_v39 }
 0x2e6   :  { %2669 = vmatprep.mubr.msk.f32.mxu0 %vm2852_vm6, %v2851_v34 }
 0x3a0   :  { %v3157_v63 = vpop.f32.mrb[4].mxu0 }
 0x3a1   :  { %v2568_v0 = vpop.f32.mrb[5].mxu0  ;;  %v901_v3 = vpop.f32.mrb[8].mxu1  ;;  %v2044_v38 = vrot.slane %v3157_v63, 1 }
 0x3a2   :  { %1711 = vst.msk [vmem:[#allocation2] sm:$0x1] %vm1710_vm13, %v901_v3  ;;  %v2580_v4 = vpop.f32.mrb[9].mxu1 }
 0x3a4   :  { %v974_v5 = vpop.f32.mrb[6].mxu0 }
 0x3a5   :  { %1712 = vst.msk [vmem:[#allocation2 + $0x1] sm:$0x1] %vm1710_vm13, %v974_v5  ;;  %v2587_v6 = vpop.f32.mrb[7].mxu0  ;;  %v1047_v7 = vpop.f32.mrb[10].mxu1 }
 0x3a6   :  { %1713 = vst.msk [vmem:[#allocation2 + $0x2] sm:$0x1] %vm1710_vm13, %v1047_v7  ;;  %v2594_v8 = vpop.f32.mrb[11].mxu1 }
 0x3a8   :  { %v1120_v9 = vpop.f32.mrb[8].mxu0 }
 0x3a9   :  { %1714 = vst.msk [vmem:[#allocation2 + $0x3] sm:$0x1] %vm1710_vm13, %v1120_v9  ;;  %v2601_v10 = vpop.f32.mrb[9].mxu0  ;;  %v1193_v11 = vpop.f32.mrb[12].mxu1 }
 0x3aa   :  { %1715 = vst.msk [vmem:[#allocation2 + $0x4] sm:$0x1] %vm1710_vm13, %v1193_v11  ;;  %v2608_v12 = vpop.f32.mrb[13].mxu1 }
 0x3ac   :  { %v1266_v13 = vpop.f32.mrb[10].mxu0 }
 0x3ad   :  { %1716 = vst.msk [vmem:[#allocation2 + $0x5] sm:$0x1] %vm1710_vm13, %v1266_v13  ;;  %v2615_v14 = vpop.f32.mrb[11].mxu0  ;;  %v1339_v15 = vpop.f32.mrb[14].mxu1 }
 0x3ae   :  { %1717 = vst.msk [vmem:[#allocation2 + $0x6] sm:$0x1] %vm1710_vm13, %v1339_v15  ;;  %v2622_v16 = vpop.f32.mrb[15].mxu1 }
 0x3b0   :  { %v1412_v1 = vpop.f32.mrb[12].mxu0 }
 0x3b1   :  { %1718 = vst.msk [vmem:[#allocation2 + $0x7] sm:$0x1] %vm1710_vm13, %v1412_v1  ;;  %v2629_v2 = vpop.f32.mrb[13].mxu0  ;;  %v1485_v17 = vpop.f32.mrb[16].mxu1 }
 0x3b2   :  { %1719 = vst.msk [vmem:[#allocation2 + $0x8] sm:$0x1] %vm1710_vm13, %v1485_v17  ;;  %v2636_v18 = vpop.f32.mrb[17].mxu1 }
 0x3b4   :  { %v1558_v19 = vpop.f32.mrb[14].mxu0 }
 0x3b5   :  { %1720 = vst.msk [vmem:[#allocation2 + $0x9] sm:$0x1] %vm1710_vm13, %v1558_v19  ;;  %v2643_v20 = vpop.f32.mrb[15].mxu0  ;;  %v1631_v21 = vpop.f32.mrb[18].mxu1 }
 0x3b6   :  { %1721 = vst.msk [vmem:[#allocation2 + $0xa] sm:$0x1] %vm1710_vm13, %v1631_v21  ;;  %v2650_v22 = vpop.f32.mrb[19].mxu1 }
 0x3b8   :  { %v1723_v23 = vld [vmem:[#allocation2] sm:$0xff]  ;;  %v1704_v24 = vpop.f32.mrb[16].mxu0 }
 0x3b9   :  { %2030 = vst.msk [vmem:[#allocation2 - $0x1] sm:$0x2] %vm2029_vm14, %v901_v3  ;;  %2031 = vst.msk [vmem:[#allocation2] sm:$0x2] %vm2029_vm14, %v974_v5  ;;  %v2657_v25 = vpop.f32.mrb[17].mxu0 }
 0x3ba   :  { %2032 = vst.msk [vmem:[#allocation2 + $0x1] sm:$0x2] %vm2029_vm14, %v1047_v7  ;;  %2033 = vst.msk [vmem:[#allocation2 + $0x2] sm:$0x2] %vm2029_vm14, %v1120_v9 }
 0x3bb   :  { %2034 = vst.msk [vmem:[#allocation2 + $0x3] sm:$0x2] %vm2029_vm14, %v1193_v11  ;;  %2035 = vst.msk [vmem:[#allocation2 + $0x4] sm:$0x2] %vm2029_vm14, %v1266_v13 }
 0x3bc   :  { %2036 = vst.msk [vmem:[#allocation2 + $0x5] sm:$0x2] %vm2029_vm14, %v1339_v15  ;;  %2037 = vst.msk [vmem:[#allocation2 + $0x6] sm:$0x2] %vm2029_vm14, %v1412_v1 }
 0x3bd   :  { %1722 = vst.msk [vmem:[#allocation2 + $0xb] sm:$0x1] %vm1710_vm13, %v1704_v24 }
 0x3c3   :  { %v2042_v32 = vld [vmem:[#allocation2] sm:$0xff] }
 0x3c4   :  { %v1724_v26 = vld [vmem:[#allocation2 + $0x8] sm:$0xf] }
 0x3c5   :  { %2038 = vst.msk [vmem:[#allocation2 + $0x7] sm:$0x2] %vm2029_vm14, %v1485_v17  ;;  %2039 = vst.msk [vmem:[#allocation2 + $0x8] sm:$0x2] %vm2029_vm14, %v1558_v19  ;;  %v2758_v28 = vpack.c.bf16 %v1724_v26, %v1723_v23 }
 0x3c6   :  { %2040 = vst.msk [vmem:[#allocation2 + $0x9] sm:$0x2] %vm2029_vm14, %v1631_v21  ;;  %2041 = vst.msk [vmem:[#allocation2 + $0xa] sm:$0x2] %vm2029_vm14, %v1704_v24 }
 0x3c7   :  { %2760 = vmatpush3.bf16.msk.msra.mxu1 %vm3180_vm1, %v2758_v28  ;;  %2764 = vmatpush3.bf16.msk.msra.mxu0 %vm3180_vm1, %v2758_v28 }
 0x3c8   :  { %2765 = vmatprep.subr.bf16.mxu1 %v2853_v48  ;;  %2769 = vmatprep.subr.bf16.mxu0 %v2853_v48 }
 0x3ca   :  { %2663 = vmatmul.mubr.msk.f32.vlgmr.msra.gmra.mrb[20].mxu1 %vm1725_vm2, %v3157_v63 }
 0x3cb   :  { %2768 = vmatpush3.bf16.msk.msra.mxu1 %vm3180_vm1, %v2758_v28  ;;  %2676 = vmatprep.mubr.msk.f32.mxu1 %vm2852_vm6, %v2851_v34 }
 0x3cc   :  { %2773 = vmatprep.subr.bf16.mxu1 %v2853_v48 }
 0x3cd   :  { %v2043_v31 = vld [vmem:[#allocation2 + $0x8] sm:$0xf] }
 0x3ce   :  { %v2774_v35 = vpack.c.bf16 %v2043_v31, %v2042_v32 }
 0x49d   :  { %v1798_v29 = vpop.f32.mrb[20].mxu1 }
 0x49e   :  { %1802 = vst.msk [vmem:[#allocation5] sm:$0x1] %vm1710_vm13, %v1798_v29  ;;  %v2664_v30 = vpop.f32.mrb[21].mxu1  ;;  %2670 = vmatmul.mubr.msk.f32.vlgmr.msra.gmra.mrb[18].mxu0 %vm1725_vm2, %v1798_v29 }
 0x49f   :  { %2772 = vmatpush3.bf16.msk.msra.mxu0 %vm3180_vm1, %v2758_v28  ;;  %2683 = vmatprep.mubr.msk.f32.mxu0 %vm2852_vm6, %v2851_v34 }
 0x4a0   :  { %2777 = vmatprep.subr.bf16.mxu0 %v2853_v48 }
 0x571   :  { %v1872_v33 = vpop.f32.mrb[18].mxu0 }
 0x572   :  { %1876 = vst.msk [vmem:[#allocation5 + $0x1] sm:$0x1] %vm1710_vm13, %v1872_v33  ;;  %v2671_v37 = vpop.f32.mrb[19].mxu0  ;;  %2677 = vmatmul.mubr.msk.f32.vlgmr.msra.gmra.mrb[22].mxu1 %vm1725_vm2, %v1872_v33 }
 0x573   :  { %2776 = vmatpush3.bf16.msk.msra.mxu1 %vm3180_vm1, %v2774_v35  ;;  %2690 = vmatprep.mubr.msk.f32.mxu1 %vm2852_vm6, %v2851_v34 }
 0x574   :  { %2781 = vmatprep.subr.bf16.mxu1 %v2853_v48 }
 0x576   :  { %2691 = vmatmul.mubr.msk.f32.vlgmr.msra.gmra.mrb[24].mxu1 %vm1725_vm2, %v2044_v38 }
 0x577   :  { %2784 = vmatpush3.bf16.msk.msra.mxu1 %vm3180_vm1, %v2774_v35  ;;  %2704 = vmatprep.mubr.msk.f32.mxu1 %vm2852_vm6, %v2851_v34 }
 0x645   :  { %v1946_v39 = vpop.f32.mrb[22].mxu1 }
 0x646   :  { %1950 = vst.msk [vmem:[#allocation5 + $0x2] sm:$0x1] %vm1710_vm13, %v1946_v39  ;;  %v2678_v40 = vpop.f32.mrb[23].mxu1  ;;  %2684 = vmatmul.mubr.msk.f32.vlgmr.msra.gmra.mrb[20].mxu0 %vm1725_vm2, %v1946_v39 }
 0x647   :  { %2780 = vmatpush3.bf16.msk.msra.mxu0 %vm3180_vm1, %v2774_v35  ;;  %2697 = vmatprep.mubr.msk.f32.mxu0 %vm2852_vm6, %v2851_v34 }
 0x648   :  { %2785 = vmatprep.subr.bf16.mxu0 %v2853_v48 }
 0x649   :  { %v2116_v41 = vpop.f32.mrb[24].mxu1 }
 0x64a   :  { %2120 = vst.msk [vmem:[#allocation5 + $0x4] sm:$0x1] %vm1710_vm13, %v2116_v41  ;;  %v2692_v42 = vpop.f32.mrb[25].mxu1  ;;  %2698 = vmatmul.mubr.msk.f32.vlgmr.msra.gmra.mrb[22].mxu0 %vm1725_vm2, %v2116_v41 }
 0x64b   :  { %2788 = vmatpush3.bf16.msk.msra.mxu0 %vm3180_vm1, %v2774_v35  ;;  %2711 = vmatprep.mubr.msk.f32.mxu0 %vm2852_vm6, %v2851_v34 }
 0x719   :  { %v2020_v43 = vpop.f32.mrb[20].mxu0 }
 0x71a   :  { %2024 = vst.msk [vmem:[#allocation5 + $0x3] sm:$0x1] %vm1710_vm13, %v2020_v43  ;;  %v2685_v36 = vpop.f32.mrb[21].mxu0 }
 0x71d   :  { %v2190_v44 = vpop.f32.mrb[22].mxu0 }
 0x71e   :  { %2194 = vst.msk [vmem:[#allocation5 + $0x5] sm:$0x1] %vm1710_vm13, %v2190_v44  ;;  %v2699_v48 = vpop.f32.mrb[23].mxu0  ;;  %2705 = vmatmul.mubr.msk.f32.vlgmr.msra.gmra.mrb[26].mxu1 %vm1725_vm2, %v2190_v44 }
 0x7f1   :  { %v2264_v45 = vpop.f32.mrb[26].mxu1 }
 0x7f2   :  { %2268 = vst.msk [vmem:[#allocation5 + $0x6] sm:$0x1] %vm1710_vm13, %v2264_v45  ;;  %v2706_v46 = vpop.f32.mrb[27].mxu1  ;;  %2712 = vmatmul.mubr.msk.f32.vlgmr.msra.gmra.mrb[24].mxu0 %vm1725_vm2, %v2264_v45 }
 0x7f3   :  { %2814 = shalt.err (!%p2811_p4)
}
 0x7f4   :  { %s2815_s8 = scalar_lea.hbm %s3274_s10, 128 }
 0x7f5   :  { %p2816_p5 = scmp.ne.s32.totalorder %s3274_s10, %s2815_s8  ;;  %p2819_p6 = scmp.lt.u32.totalorder %s2815_s8, %s3274_s10 }
 0x7f7   :  { %p2821_p7 = pnand %p2819_p6, %p2816_p5 }
 0x7f9   :  { %2824 = shalt.err (!%p2821_p7)
}
 0x7fa   :  { %2352 = dma.vmem_to_hbm [thread:$0]  %s2350_s1, 128, %s3274_s10, [#allocation4]  }
 0x7fb   :  { %s2856_s15 = smov [#allocation5]  }
 0x7fc   :  { %s2359_s16 = sshll.u32 %s2856_s15, 4  ;;  %s2360_s16 = int_to_ptr.vmem [resolvable:$true] %s2359_s16 }
 0x7fd   :  { %s2825_s17 = scalar_lea.vmem %s2360_s16, 128  ;;  %p2830_p9 = scmp.lt.s32.totalorder %s2360_s16, %s2360_s16 }
 0x7fe   :  { %p2826_p8 = scmp.ne.s32.totalorder %s2360_s16, %s2825_s17  ;;  %p2831_p10 = scmp.lt.s32.totalorder %s2825_s17, %s2825_s17 }
 0x800   :  { %p2832_p11 = por %p2831_p10, %p2830_p9 }
 0x802   :  { %p2833_p12 = pnand %p2832_p11, %p2826_p8 }
 0x8c5   :  { %v2338_v34 = vpop.f32.mrb[24].mxu0 }
 0x8c6   :  { %2342 = vst.msk [vmem:[#allocation5 + $0x7] sm:$0x1] %vm1710_vm13, %v2338_v34  ;;  %v2713_v47 = vpop.f32.mrb[25].mxu0 }
 0x8c7   :  { %2836 = shalt.err (!%p2833_p12)
}
 0x8c8   :  { %s2837_s20 = scalar_lea.hbm %s3275_s11, 128 }
 0x8c9   :  { %p2838_p13 = scmp.ne.s32.totalorder %s3275_s11, %s2837_s20  ;;  %p2841_p0 = scmp.lt.u32.totalorder %s2837_s20, %s3275_s11 }
 0x8cb   :  { %p2843_p1 = pnand %p2841_p0, %p2838_p13 }
 0x8cd   :  { %2846 = shalt.err (!%p2843_p1)
}
 0x8ce   :  { %2362 = dma.vmem_to_hbm [thread:$0]  %s2360_s16, 128, %s3275_s11, [#allocation6]  }
 0x8cf   :  { %2847 = dma.done.wait [#allocation4], 128  }
 0x8d0   :  { %2848 = vsyncadd [#allocation4], 4294967168 }
 0x8d1   :  { %2849 = dma.done.wait [#allocation6], 128  }
 0x8d2   :  { %2850 = vsyncadd [#allocation6], 4294967168 }
 0x8d3   :  { %2369 = vsyncpa [#allocation4], 1 }
 0x8d4   :  { %2370 = vsyncpa [#allocation6], 1 }

</bundles_post_ra>
